<compile_context>
chip_gen: v5e
topology: v5e:2x2
jax: 0.10.0
libtpu: 0.0.40
codegen_flags: <defaults>
</compile_context>

<pallas_src>
import jax
import jax.numpy as jnp
from jax.experimental import pallas as pl
from jax.experimental.pallas import tpu as pltpu


PAD_N = 256            # node count padded to a multiple of this (minimum tile)
LANE = 128             # feature dims padded to the lane width
FUSED_MAX_NP = 1024    # fully-VMEM-resident single-kernel forward up to this Np
_VMEM_LIMIT = 32 * 1024 * 1024   # explicit; safe on v5e/v6e/v7x


def _round_up(x, m):
    return (x + m - 1) // m * m


def _pick_tile(np_):
    """Largest row/reduction tile that divides the padded node count."""
    for t in (1024, 512, 256):
        if np_ % t == 0:
            return t
    return 256  # unreachable: Np is always a multiple of PAD_N


# ----------------------------- Pallas kernels ------------------------------

def fused_forward_kernel(a_ref, p_ref, x_ref, w1_ref, b1_ref, w2_ref, b2_ref,
                         wf_ref, bf_ref, o_ref):
    """Whole forward, everything resident in VMEM (small/medium graphs)."""
    f32, bf16 = jnp.float32, jnp.bfloat16
    # conv1 projection (shared weights), then both edge-set aggregations.
    xw1 = jnp.dot(x_ref[...], w1_ref[...], preferred_element_type=f32).astype(bf16)
    b1 = b1_ref[...]
    h1_0 = jnp.maximum(jnp.dot(a_ref[0], xw1, preferred_element_type=f32) + b1,
                       0.0).astype(bf16)
    h1_1 = jnp.maximum(jnp.dot(a_ref[1], xw1, preferred_element_type=f32) + b1,
                       0.0).astype(bf16)
    # conv2 projection with the hstack folded: Xcat @ W2 = H1_0 @ W2t + H1_1 @ W2b
    xw2 = (jnp.dot(h1_0, w2_ref[0], preferred_element_type=f32)
           + jnp.dot(h1_1, w2_ref[1], preferred_element_type=f32)).astype(bf16)
    b2 = b2_ref[...]
    h2_0 = jnp.maximum(jnp.dot(a_ref[0], xw2, preferred_element_type=f32) + b2, 0.0)
    h2_1 = jnp.maximum(jnp.dot(a_ref[1], xw2, preferred_element_type=f32) + b2, 0.0)
    # global mean pool (P @ .) + fc, with the second hstack folded as well.
    p = p_ref[...]
    pooled0 = jnp.dot(p, h2_0, preferred_element_type=f32)
    pooled1 = jnp.dot(p, h2_1, preferred_element_type=f32)
    o_ref[...] = (jnp.dot(pooled0, wf_ref[0], preferred_element_type=f32)
                  + jnp.dot(pooled1, wf_ref[1], preferred_element_type=f32)
                  + bf_ref[...])


def proj1_kernel(x_ref, w_ref, o_ref):
    # XW1 = X @ W1 (row-tiled)
    o_ref[...] = jnp.dot(x_ref[...], w_ref[...],
                         preferred_element_type=jnp.float32).astype(o_ref.dtype)


def proj2_kernel(h_ref, w_ref, o_ref):
    # XW2 = hstack(H1_e1, H1_e2) @ W2 == H1[0] @ W2_top + H1[1] @ W2_bot
    acc = jnp.dot(h_ref[0], w_ref[0], preferred_element_type=jnp.float32)
    acc = acc + jnp.dot(h_ref[1], w_ref[1], preferred_element_type=jnp.float32)
    o_ref[...] = acc.astype(o_ref.dtype)


def adj_relu_kernel(a_ref, xw_ref, b_ref, o_ref, acc0_ref, acc1_ref):
    # o[e, i, :] = relu( sum_k Ahat[e, i_blk, k_blk] @ XW[k_blk, :] + b )
    # Both edge sets handled in ONE grid step: the same XW block feeds two dots.
    k = pl.program_id(1)

    @pl.when(k == 0)
    def _():
        acc0_ref[...] = jnp.zeros_like(acc0_ref)
        acc1_ref[...] = jnp.zeros_like(acc1_ref)

    xw = xw_ref[...]
    acc0_ref[...] += jnp.dot(a_ref[0], xw, preferred_element_type=jnp.float32)
    acc1_ref[...] += jnp.dot(a_ref[1], xw, preferred_element_type=jnp.float32)

    @pl.when(k == pl.num_programs(1) - 1)
    def _():
        b = b_ref[...]
        o_ref[0] = jnp.maximum(acc0_ref[...] + b, 0.0).astype(o_ref.dtype)
        o_ref[1] = jnp.maximum(acc1_ref[...] + b, 0.0).astype(o_ref.dtype)


def adj2_pool_fc_kernel(a_ref, xw_ref, b_ref, p_ref, wf_ref, bf_ref, o_ref,
                        acc0_ref, acc1_ref, pool0_ref, pool1_ref):
    # Second GCN layer with mean-pool + fc fused into the epilogue: h2 never
    # touches HBM.  pool*_ref are carried across the row axis (both axes
    # "arbitrary"); logits are emitted on the very last grid step.
    i = pl.program_id(0)
    k = pl.program_id(1)
    last_i = pl.num_programs(0) - 1
    last_k = pl.num_programs(1) - 1

    @pl.when(jnp.logical_and(i == 0, k == 0))
    def _():
        pool0_ref[...] = jnp.zeros_like(pool0_ref)
        pool1_ref[...] = jnp.zeros_like(pool1_ref)

    @pl.when(k == 0)
    def _():
        acc0_ref[...] = jnp.zeros_like(acc0_ref)
        acc1_ref[...] = jnp.zeros_like(acc1_ref)

    xw = xw_ref[...]
    acc0_ref[...] += jnp.dot(a_ref[0], xw, preferred_element_type=jnp.float32)
    acc1_ref[...] += jnp.dot(a_ref[1], xw, preferred_element_type=jnp.float32)

    @pl.when(k == last_k)
    def _():
        b = b_ref[...]
        h2_0 = jnp.maximum(acc0_ref[...] + b, 0.0)          # (tm, H2p) f32
        h2_1 = jnp.maximum(acc1_ref[...] + b, 0.0)
        p = p_ref[...]                                       # (Gp, tm)  f32
        pool0_ref[...] += jnp.dot(p, h2_0, preferred_element_type=jnp.float32)
        pool1_ref[...] += jnp.dot(p, h2_1, preferred_element_type=jnp.float32)

    @pl.when(jnp.logical_and(i == last_i, k == last_k))
    def _():
        o_ref[...] = (jnp.dot(pool0_ref[...], wf_ref[0],
                              preferred_element_type=jnp.float32)
                      + jnp.dot(pool1_ref[...], wf_ref[1],
                                preferred_element_type=jnp.float32)
                      + bf_ref[...])


# ----------------------------- kernel wrappers ------------------------------

def fused_forward(a_stack, pool_mat, x_pad, prepared):
    gp = pool_mat.shape[0]
    cp = prepared["wf"].shape[2]
    return pl.pallas_call(
        fused_forward_kernel,
        out_shape=jax.ShapeDtypeStruct((gp, cp), jnp.float32),
        compiler_params=pltpu.CompilerParams(vmem_limit_bytes=_VMEM_LIMIT),
    )(a_stack, pool_mat, x_pad, prepared["w1"], prepared["b1"],
      prepared["w2"], prepared["b2"], prepared["wf"], prepared["bf"])


def project1(x_pad, w1_pad):
    np_, f = x_pad.shape
    hp = w1_pad.shape[1]
    tm = _pick_tile(np_)
    return pl.pallas_call(
        proj1_kernel,
        grid=(np_ // tm,),
        in_specs=[pl.BlockSpec((tm, f), lambda i: (i, 0)),
                  pl.BlockSpec((f, hp), lambda i: (0, 0))],
        out_specs=pl.BlockSpec((tm, hp), lambda i: (i, 0)),
        out_shape=jax.ShapeDtypeStruct((np_, hp), jnp.bfloat16),
        compiler_params=pltpu.CompilerParams(
            dimension_semantics=("parallel",), vmem_limit_bytes=_VMEM_LIMIT),
    )(x_pad, w1_pad)


def project2(h1, w2_pad):
    _, np_, hp = h1.shape
    h2p = w2_pad.shape[2]
    tm = _pick_tile(np_)
    return pl.pallas_call(
        proj2_kernel,
        grid=(np_ // tm,),
        in_specs=[pl.BlockSpec((2, tm, hp), lambda i: (0, i, 0)),
                  pl.BlockSpec((2, hp, h2p), lambda i: (0, 0, 0))],
        out_specs=pl.BlockSpec((tm, h2p), lambda i: (i, 0)),
        out_shape=jax.ShapeDtypeStruct((np_, h2p), jnp.bfloat16),
        compiler_params=pltpu.CompilerParams(
            dimension_semantics=("parallel",), vmem_limit_bytes=_VMEM_LIMIT),
    )(h1, w2_pad)


def gcn_adj_layer(a_stack, xw, bias_pad):
    # a_stack: (2, Np, Np) bf16, xw: (Np, ch) bf16, bias_pad: (1, ch) f32
    np_ = a_stack.shape[1]
    ch = xw.shape[1]
    tm = _pick_tile(np_)
    tk = _pick_tile(np_)
    flops = 2 * 2 * np_ * np_ * ch
    bytes_accessed = (2 * np_ * np_ * 2              # bf16 Ahat stream (both sets)
                      + (np_ // tm) * np_ * ch * 2   # bf16 XW re-reads (shared)
                      + 2 * np_ * ch * 2)            # bf16 activation writeback
    return pl.pallas_call(
        adj_relu_kernel,
        grid=(np_ // tm, np_ // tk),
        in_specs=[pl.BlockSpec((2, tm, tk), lambda i, k: (0, i, k)),
                  pl.BlockSpec((tk, ch), lambda i, k: (k, 0)),
                  pl.BlockSpec((1, ch), lambda i, k: (0, 0))],
        out_specs=pl.BlockSpec((2, tm, ch), lambda i, k: (0, i, 0)),
        out_shape=jax.ShapeDtypeStruct((2, np_, ch), jnp.bfloat16),
        scratch_shapes=[pltpu.VMEM((tm, ch), jnp.float32),
                        pltpu.VMEM((tm, ch), jnp.float32)],
        compiler_params=pltpu.CompilerParams(
            dimension_semantics=("parallel", "arbitrary"),
            vmem_limit_bytes=_VMEM_LIMIT),
        cost_estimate=pl.CostEstimate(flops=flops, transcendentals=0,
                                      bytes_accessed=bytes_accessed),
    )(a_stack, xw, bias_pad)


def gcn_adj2_pool_fc(a_stack, xw, bias_pad, pool_mat, wf_pad, bf_pad):
    np_ = a_stack.shape[1]
    ch = xw.shape[1]           # = H2p
    gp = pool_mat.shape[0]
    cp = wf_pad.shape[2]
    tm = _pick_tile(np_)
    tk = _pick_tile(np_)
    flops = 2 * 2 * np_ * np_ * ch
    bytes_accessed = (2 * np_ * np_ * 2
                      + (np_ // tm) * np_ * ch * 2
                      + gp * np_ * 4)
    return pl.pallas_call(
        adj2_pool_fc_kernel,
        grid=(np_ // tm, np_ // tk),
        in_specs=[pl.BlockSpec((2, tm, tk), lambda i, k: (0, i, k)),
                  pl.BlockSpec((tk, ch), lambda i, k: (k, 0)),
                  pl.BlockSpec((1, ch), lambda i, k: (0, 0)),
                  pl.BlockSpec((gp, tm), lambda i, k: (0, i)),
                  pl.BlockSpec((2, ch, cp), lambda i, k: (0, 0, 0)),
                  pl.BlockSpec((1, cp), lambda i, k: (0, 0))],
        out_specs=pl.BlockSpec((gp, cp), lambda i, k: (0, 0)),
        out_shape=jax.ShapeDtypeStruct((gp, cp), jnp.float32),
        scratch_shapes=[pltpu.VMEM((tm, ch), jnp.float32),
                        pltpu.VMEM((tm, ch), jnp.float32),
                        pltpu.VMEM((gp, ch), jnp.float32),
                        pltpu.VMEM((gp, ch), jnp.float32)],
        compiler_params=pltpu.CompilerParams(
            dimension_semantics=("arbitrary", "arbitrary"),
            vmem_limit_bytes=_VMEM_LIMIT),
        cost_estimate=pl.CostEstimate(flops=flops, transcendentals=0,
                                      bytes_accessed=bytes_accessed),
    )(a_stack, xw, bias_pad, pool_mat, wf_pad, bf_pad)


# --------------------- one-time graph / param preprocessing -----------------

def normalized_adjacency(edge_index, num_nodes, n_pad):
    """Dense Ahat = D^{-1/2}(A+I)D^{-1/2} (PyG GCNConv norm), zero-padded."""
    src = edge_index[0]
    dst = edge_index[1]
    loops = jnp.arange(num_nodes, dtype=edge_index.dtype)
    src = jnp.concatenate([src, loops])
    dst = jnp.concatenate([dst, loops])
    a = jnp.zeros((num_nodes, num_nodes), jnp.float32).at[dst, src].add(1.0)
    deg = a.sum(axis=1)
    dinv = jnp.where(deg > 0, 1.0 / jnp.sqrt(deg), 0.0)
    ahat = a * dinv[:, None] * dinv[None, :]
    pad = n_pad - num_nodes
    return jnp.pad(ahat, ((0, pad), (0, pad)))


def mean_pool_matrix(batch, num_graphs, n_pad):
    """P[g, n] = 1/|graph g| if batch[n]==g else 0, padded to (Gp, Np)."""
    n = batch.shape[0]
    g_pad = _round_up(num_graphs, 8)
    onehot = (batch[None, :] == jnp.arange(num_graphs)[:, None]).astype(jnp.float32)
    counts = onehot.sum(axis=1, keepdims=True)
    p = onehot / jnp.maximum(counts, 1.0)
    return jnp.pad(p, ((0, g_pad - num_graphs), (0, n_pad - n)))


def preprocess_graphs(edge_index1, edge_index2, batch, num_nodes, num_graphs,
                      n_pad=None):
    if n_pad is None:
        n_pad = _round_up(num_nodes, PAD_N)
    a1 = normalized_adjacency(edge_index1, num_nodes, n_pad)
    a2 = normalized_adjacency(edge_index2, num_nodes, n_pad)
    a_stack = jnp.stack([a1, a2]).astype(jnp.bfloat16)   # bf16 Ahat stream
    pool_mat = mean_pool_matrix(batch, num_graphs, n_pad)
    return a_stack, pool_mat


def prepare_params(params):
    """Pad feature dims to 128 lanes, split W2/Wf into hstack halves, bf16 weights."""
    w1, b1 = params["w1"], params["b1"]
    w2, b2 = params["w2"], params["b2"]
    wf, bf = params["wf"], params["bf"]
    f, h = w1.shape
    h2 = w2.shape[1]                 # = 2*hidden
    c = wf.shape[1]
    hp = _round_up(h, LANE)
    h2p = _round_up(h2, LANE)
    cp = _round_up(c, LANE)

    w1_pad = jnp.zeros((f, hp), jnp.float32).at[:, :h].set(w1).astype(jnp.bfloat16)
    b1_pad = jnp.zeros((1, hp), jnp.float32).at[0, :h].set(b1)

    w2_pad = jnp.zeros((2, hp, h2p), jnp.float32)
    w2_pad = w2_pad.at[0, :h, :h2].set(w2[:h])
    w2_pad = w2_pad.at[1, :h, :h2].set(w2[h:])
    w2_pad = w2_pad.astype(jnp.bfloat16)
    b2_pad = jnp.zeros((1, h2p), jnp.float32).at[0, :h2].set(b2)

    # fc weights are tiny; keep them f32 for the final accumulation.
    wf_pad = jnp.zeros((2, h2p, cp), jnp.float32)
    wf_pad = wf_pad.at[0, :h2, :c].set(wf[:h2])
    wf_pad = wf_pad.at[1, :h2, :c].set(wf[h2:])
    bf_pad = jnp.zeros((1, cp), jnp.float32).at[0, :c].set(bf)

    return dict(w1=w1_pad, b1=b1_pad, w2=w2_pad, b2=b2_pad,
                wf=wf_pad, bf=bf_pad)


# --------------------------------- forward ----------------------------------

@jax.jit
def gcn_forward_fused(prepared, a_stack, pool_mat, x):
    n = x.shape[0]
    n_pad = a_stack.shape[1]
    x_pad = jnp.pad(x, ((0, n_pad - n), (0, 0))).astype(jnp.bfloat16)
    return fused_forward(a_stack, pool_mat, x_pad, prepared)


@jax.jit
def gcn_forward_tiled(prepared, a_stack, pool_mat, x):
    n = x.shape[0]
    n_pad = a_stack.shape[1]
    x_pad = jnp.pad(x, ((0, n_pad - n), (0, 0))).astype(jnp.bfloat16)
    xw1 = project1(x_pad, prepared["w1"])               # (Np, Hp)    bf16
    h1 = gcn_adj_layer(a_stack, xw1, prepared["b1"])    # (2, Np, Hp) bf16
    xw2 = project2(h1, prepared["w2"])                  # (Np, H2p)   bf16
    # conv2 + mean-pool + fc fused: h2 never materializes in HBM
    return gcn_adj2_pool_fc(a_stack, xw2, prepared["b2"], pool_mat,
                            prepared["wf"], prepared["bf"])


def gcn_forward(prepared, a_stack, pool_mat, x, num_graphs, num_classes):
    n_pad = a_stack.shape[1]
    if n_pad <= FUSED_MAX_NP:
        out = gcn_forward_fused(prepared, a_stack, pool_mat, x)
    else:
        out = gcn_forward_tiled(prepared, a_stack, pool_mat, x)
    return out[:num_graphs, :num_classes]


# ---------------------------- pure-JAX reference -----------------------------

def gcn_reference(params, x, edge_index1, edge_index2, batch,
                  num_nodes, num_graphs):
    def ahat(ei):
        loops = jnp.arange(num_nodes, dtype=ei.dtype)
        src = jnp.concatenate([ei[0], loops])
        dst = jnp.concatenate([ei[1], loops])
        a = jnp.zeros((num_nodes, num_nodes), jnp.float32).at[dst, src].add(1.0)
        deg = a.sum(axis=1)
        dinv = jnp.where(deg > 0, 1.0 / jnp.sqrt(deg), 0.0)
        return a * dinv[:, None] * dinv[None, :]

    a1, a2 = ahat(edge_index1), ahat(edge_index2)

    def conv(a, h, w, b):
        return a @ (h @ w) + b

    h1 = jnp.concatenate([jax.nn.relu(conv(a1, x, params["w1"], params["b1"])),
                          jax.nn.relu(conv(a2, x, params["w1"], params["b1"]))],
                         axis=1)
    h2 = jnp.concatenate([jax.nn.relu(conv(a1, h1, params["w2"], params["b2"])),
                          jax.nn.relu(conv(a2, h1, params["w2"], params["b2"]))],
                         axis=1)
    onehot = (batch[None, :] == jnp.arange(num_graphs)[:, None]).astype(jnp.float32)
    pooled = (onehot @ h2) / jnp.maximum(onehot.sum(axis=1, keepdims=True), 1.0)
    return pooled @ params["wf"] + params["bf"]


# ----------------------------------- main ------------------------------------

if __name__ == "__main__":
    num_node_features = 8
    hidden_channels = 32
    num_classes = 4
    num_nodes = 16
    num_graphs = 2
    num_edges = 32

    key = jax.random.PRNGKey(0)
    k_x, k_e1, k_e2, k_w1, k_b1, k_w2, k_b2, k_wf, k_bf = jax.random.split(key, 9)

    x = jax.random.normal(k_x, (num_nodes, num_node_features), jnp.float32)
    edge_index1 = jax.random.randint(k_e1, (2, num_edges), 0, num_nodes, jnp.int32)
    edge_index2 = jax.random.randint(k_e2, (2, num_edges), 0, num_nodes, jnp.int32)
    batch = jnp.concatenate([
        jnp.zeros(num_nodes // 2, jnp.int32),
        jnp.ones(num_nodes - num_nodes // 2, jnp.int32),
    ])

    # Deterministic parameter init (synthetic; matches PyTorch module shapes).
    params = {
        # conv1: GCNConv(num_node_features, hidden_channels)
        "w1": jax.random.normal(k_w1, (num_node_features, hidden_channels),
                                jnp.float32) * 0.1,
        "b1": jax.random.normal(k_b1, (hidden_channels,), jnp.float32) * 0.1,
        # conv2: GCNConv(2H, 2H)
        "w2": jax.random.normal(k_w2, (2 * hidden_channels, 2 * hidden_channels),
                                jnp.float32) * 0.1,
        "b2": jax.random.normal(k_b2, (2 * hidden_channels,), jnp.float32) * 0.1,
        # fc: Linear(4H, num_classes)  (stored as [in, out] == W^T of nn.Linear)
        "wf": jax.random.normal(k_wf, (4 * hidden_channels, num_classes),
                                jnp.float32) * 0.1,
        "bf": jax.random.normal(k_bf, (num_classes,), jnp.float32) * 0.1,
    }

    prepared = prepare_params(params)

    # --- small-graph path: single fully fused, VMEM-resident kernel ----------
    a_stack, pool_mat = preprocess_graphs(edge_index1, edge_index2, batch,
                                          num_nodes, num_graphs)
    out = gcn_forward(prepared, a_stack, pool_mat, x, num_graphs, num_classes)
    out = jax.block_until_ready(out)
    assert out.shape == (num_graphs, num_classes)

    # --- large-graph (tiled) path: force it by padding Np past the fusion
    #     threshold; the extra rows/cols are zero so the logits must agree. ---
    a_big, pool_big = preprocess_graphs(edge_index1, edge_index2, batch,
                                        num_nodes, num_graphs, n_pad=2048)
    out_big = gcn_forward(prepared, a_big, pool_big, x, num_graphs, num_classes)
    out_big = jax.block_until_ready(out_big)
    assert out_big.shape == (num_graphs, num_classes)
    assert bool(jnp.allclose(out, out_big, atol=5e-2, rtol=5e-2))

    # --- pure-JAX f32 reference (bf16 streaming => loose tolerance) ----------
    ref = gcn_reference(params, x, edge_index1, edge_index2, batch,
                        num_nodes, num_graphs)
    ref = jax.block_until_ready(ref)
    assert bool(jnp.allclose(out, ref, atol=5e-2, rtol=5e-2))

    print("KERNEL_OK")
</pallas_src>

<mosaic_0001>
module attributes {stable_mosaic.version = 11 : i64} {
  func.func @fused_forward_kernel(%arg0: memref<2x256x256xbf16, #tpu.memory_space<vmem>>, %arg1: memref<8x256xf32, #tpu.memory_space<vmem>>, %arg2: memref<256x8xbf16, #tpu.memory_space<vmem>>, %arg3: memref<8x128xbf16, #tpu.memory_space<vmem>>, %arg4: memref<1x128xf32, #tpu.memory_space<vmem>>, %arg5: memref<2x128x128xbf16, #tpu.memory_space<vmem>>, %arg6: memref<1x128xf32, #tpu.memory_space<vmem>>, %arg7: memref<2x128x128xf32, #tpu.memory_space<vmem>>, %arg8: memref<1x128xf32, #tpu.memory_space<vmem>>, %arg9: memref<8x128xf32, #tpu.memory_space<vmem>>) attributes {dimension_semantics = [], scalar_prefetch = 0 : i64, scratch_operands = 0 : i64, tpu.core_type = #tpu.core_type<tc>} {
    %c0 = arith.constant 0 : index
    %c0_0 = arith.constant 0 : index
    %0 = vector.load %arg2[%c0, %c0_0] : memref<256x8xbf16, #tpu.memory_space<vmem>>, vector<256x8xbf16>
    %c0_1 = arith.constant 0 : index
    %c0_2 = arith.constant 0 : index
    %1 = vector.load %arg3[%c0_1, %c0_2] : memref<8x128xbf16, #tpu.memory_space<vmem>>, vector<8x128xbf16>
    %cst = arith.constant dense<0.000000e+00> : vector<256x128xf32>
    %2 = tpu.matmul %0, %1, %cst {dimension_numbers = #tpu.dot_dimension_numbers<[1], [0], [0], [1], [0, 0, 1, 1], [], []>} : vector<256x8xbf16>, vector<8x128xbf16>, vector<256x128xf32> -> vector<256x128xf32>
    %3 = arith.truncf %2 : vector<256x128xf32> to vector<256x128xbf16>
    %c0_3 = arith.constant 0 : index
    %c0_4 = arith.constant 0 : index
    %4 = vector.load %arg4[%c0_3, %c0_4] : memref<1x128xf32, #tpu.memory_space<vmem>>, vector<1x128xf32>
    %c0_5 = arith.constant 0 : index
    %c0_6 = arith.constant 0 : index
    %c0_7 = arith.constant 0 : index
    %5 = vector.load %arg0[%c0_5, %c0_6, %c0_7] : memref<2x256x256xbf16, #tpu.memory_space<vmem>>, vector<1x256x256xbf16>
    %6 = vector.shape_cast %5 : vector<1x256x256xbf16> to vector<256x256xbf16>
    %cst_8 = arith.constant dense<0.000000e+00> : vector<256x128xf32>
    %7 = tpu.matmul %6, %3, %cst_8 {dimension_numbers = #tpu.dot_dimension_numbers<[1], [0], [0], [1], [0, 0, 1, 1], [], []>} : vector<256x256xbf16>, vector<256x128xbf16>, vector<256x128xf32> -> vector<256x128xf32>
    %8 = vector.broadcast %4 : vector<1x128xf32> to vector<256x128xf32>
    %9 = arith.addf %7, %8 : vector<256x128xf32>
    %cst_9 = arith.constant 0.000000e+00 : f32
    %10 = vector.broadcast %cst_9 : f32 to vector<256x128xf32>
    %11 = arith.maximumf %9, %10 : vector<256x128xf32>
    %12 = arith.truncf %11 : vector<256x128xf32> to vector<256x128xbf16>
    %c1 = arith.constant 1 : index
    %c0_10 = arith.constant 0 : index
    %c0_11 = arith.constant 0 : index
    %13 = vector.load %arg0[%c1, %c0_10, %c0_11] : memref<2x256x256xbf16, #tpu.memory_space<vmem>>, vector<1x256x256xbf16>
    %14 = vector.shape_cast %13 : vector<1x256x256xbf16> to vector<256x256xbf16>
    %cst_12 = arith.constant dense<0.000000e+00> : vector<256x128xf32>
    %15 = tpu.matmul %14, %3, %cst_12 {dimension_numbers = #tpu.dot_dimension_numbers<[1], [0], [0], [1], [0, 0, 1, 1], [], []>} : vector<256x256xbf16>, vector<256x128xbf16>, vector<256x128xf32> -> vector<256x128xf32>
    %16 = vector.broadcast %4 : vector<1x128xf32> to vector<256x128xf32>
    %17 = arith.addf %15, %16 : vector<256x128xf32>
    %cst_13 = arith.constant 0.000000e+00 : f32
    %18 = vector.broadcast %cst_13 : f32 to vector<256x128xf32>
    %19 = arith.maximumf %17, %18 : vector<256x128xf32>
    %20 = arith.truncf %19 : vector<256x128xf32> to vector<256x128xbf16>
    %c0_14 = arith.constant 0 : index
    %c0_15 = arith.constant 0 : index
    %c0_16 = arith.constant 0 : index
    %21 = vector.load %arg5[%c0_14, %c0_15, %c0_16] : memref<2x128x128xbf16, #tpu.memory_space<vmem>>, vector<1x128x128xbf16>
    %22 = vector.shape_cast %21 : vector<1x128x128xbf16> to vector<128x128xbf16>
    %cst_17 = arith.constant dense<0.000000e+00> : vector<256x128xf32>
    %23 = tpu.matmul %12, %22, %cst_17 {dimension_numbers = #tpu.dot_dimension_numbers<[1], [0], [0], [1], [0, 0, 1, 1], [], []>} : vector<256x128xbf16>, vector<128x128xbf16>, vector<256x128xf32> -> vector<256x128xf32>
    %c1_18 = arith.constant 1 : index
    %c0_19 = arith.constant 0 : index
    %c0_20 = arith.constant 0 : index
    %24 = vector.load %arg5[%c1_18, %c0_19, %c0_20] : memref<2x128x128xbf16, #tpu.memory_space<vmem>>, vector<1x128x128xbf16>
    %25 = vector.shape_cast %24 : vector<1x128x128xbf16> to vector<128x128xbf16>
    %cst_21 = arith.constant dense<0.000000e+00> : vector<256x128xf32>
    %26 = tpu.matmul %20, %25, %cst_21 {dimension_numbers = #tpu.dot_dimension_numbers<[1], [0], [0], [1], [0, 0, 1, 1], [], []>} : vector<256x128xbf16>, vector<128x128xbf16>, vector<256x128xf32> -> vector<256x128xf32>
    %27 = arith.addf %23, %26 : vector<256x128xf32>
    %28 = arith.truncf %27 : vector<256x128xf32> to vector<256x128xbf16>
    %c0_22 = arith.constant 0 : index
    %c0_23 = arith.constant 0 : index
    %29 = vector.load %arg6[%c0_22, %c0_23] : memref<1x128xf32, #tpu.memory_space<vmem>>, vector<1x128xf32>
    %c0_24 = arith.constant 0 : index
    %c0_25 = arith.constant 0 : index
    %c0_26 = arith.constant 0 : index
    %30 = vector.load %arg0[%c0_24, %c0_25, %c0_26] : memref<2x256x256xbf16, #tpu.memory_space<vmem>>, vector<1x256x256xbf16>
    %31 = vector.shape_cast %30 : vector<1x256x256xbf16> to vector<256x256xbf16>
    %cst_27 = arith.constant dense<0.000000e+00> : vector<256x128xf32>
    %32 = tpu.matmul %31, %28, %cst_27 {dimension_numbers = #tpu.dot_dimension_numbers<[1], [0], [0], [1], [0, 0, 1, 1], [], []>} : vector<256x256xbf16>, vector<256x128xbf16>, vector<256x128xf32> -> vector<256x128xf32>
    %33 = vector.broadcast %29 : vector<1x128xf32> to vector<256x128xf32>
    %34 = arith.addf %32, %33 : vector<256x128xf32>
    %cst_28 = arith.constant 0.000000e+00 : f32
    %35 = vector.broadcast %cst_28 : f32 to vector<256x128xf32>
    %36 = arith.maximumf %34, %35 : vector<256x128xf32>
    %c1_29 = arith.constant 1 : index
    %c0_30 = arith.constant 0 : index
    %c0_31 = arith.constant 0 : index
    %37 = vector.load %arg0[%c1_29, %c0_30, %c0_31] : memref<2x256x256xbf16, #tpu.memory_space<vmem>>, vector<1x256x256xbf16>
    %38 = vector.shape_cast %37 : vector<1x256x256xbf16> to vector<256x256xbf16>
    %cst_32 = arith.constant dense<0.000000e+00> : vector<256x128xf32>
    %39 = tpu.matmul %38, %28, %cst_32 {dimension_numbers = #tpu.dot_dimension_numbers<[1], [0], [0], [1], [0, 0, 1, 1], [], []>} : vector<256x256xbf16>, vector<256x128xbf16>, vector<256x128xf32> -> vector<256x128xf32>
    %40 = vector.broadcast %29 : vector<1x128xf32> to vector<256x128xf32>
    %41 = arith.addf %39, %40 : vector<256x128xf32>
    %cst_33 = arith.constant 0.000000e+00 : f32
    %42 = vector.broadcast %cst_33 : f32 to vector<256x128xf32>
    %43 = arith.maximumf %41, %42 : vector<256x128xf32>
    %c0_34 = arith.constant 0 : index
    %c0_35 = arith.constant 0 : index
    %44 = vector.load %arg1[%c0_34, %c0_35] : memref<8x256xf32, #tpu.memory_space<vmem>>, vector<8x256xf32>
    %cst_36 = arith.constant dense<0.000000e+00> : vector<8x128xf32>
    %45 = tpu.matmul %44, %36, %cst_36 {dimension_numbers = #tpu.dot_dimension_numbers<[1], [0], [0], [1], [0, 0, 1, 1], [], []>} : vector<8x256xf32>, vector<256x128xf32>, vector<8x128xf32> -> vector<8x128xf32>
    %cst_37 = arith.constant dense<0.000000e+00> : vector<8x128xf32>
    %46 = tpu.matmul %44, %43, %cst_37 {dimension_numbers = #tpu.dot_dimension_numbers<[1], [0], [0], [1], [0, 0, 1, 1], [], []>} : vector<8x256xf32>, vector<256x128xf32>, vector<8x128xf32> -> vector<8x128xf32>
    %c0_38 = arith.constant 0 : index
    %c0_39 = arith.constant 0 : index
    %c0_40 = arith.constant 0 : index
    %47 = vector.load %arg7[%c0_38, %c0_39, %c0_40] : memref<2x128x128xf32, #tpu.memory_space<vmem>>, vector<1x128x128xf32>
    %48 = vector.shape_cast %47 : vector<1x128x128xf32> to vector<128x128xf32>
    %cst_41 = arith.constant dense<0.000000e+00> : vector<8x128xf32>
    %49 = tpu.matmul %45, %48, %cst_41 {dimension_numbers = #tpu.dot_dimension_numbers<[1], [0], [0], [1], [0, 0, 1, 1], [], []>} : vector<8x128xf32>, vector<128x128xf32>, vector<8x128xf32> -> vector<8x128xf32>
    %c1_42 = arith.constant 1 : index
    %c0_43 = arith.constant 0 : index
    %c0_44 = arith.constant 0 : index
    %50 = vector.load %arg7[%c1_42, %c0_43, %c0_44] : memref<2x128x128xf32, #tpu.memory_space<vmem>>, vector<1x128x128xf32>
    %51 = vector.shape_cast %50 : vector<1x128x128xf32> to vector<128x128xf32>
    %cst_45 = arith.constant dense<0.000000e+00> : vector<8x128xf32>
    %52 = tpu.matmul %46, %51, %cst_45 {dimension_numbers = #tpu.dot_dimension_numbers<[1], [0], [0], [1], [0, 0, 1, 1], [], []>} : vector<8x128xf32>, vector<128x128xf32>, vector<8x128xf32> -> vector<8x128xf32>
    %53 = arith.addf %49, %52 : vector<8x128xf32>
    %c0_46 = arith.constant 0 : index
    %c0_47 = arith.constant 0 : index
    %54 = vector.load %arg8[%c0_46, %c0_47] : memref<1x128xf32, #tpu.memory_space<vmem>>, vector<1x128xf32>
    %55 = vector.broadcast %54 : vector<1x128xf32> to vector<8x128xf32>
    %56 = arith.addf %53, %55 : vector<8x128xf32>
    %c0_48 = arith.constant 0 : index
    %c0_49 = arith.constant 0 : index
    %57 = vector.load %arg9[%c0_48, %c0_49] : memref<8x128xf32, #tpu.memory_space<vmem>>, vector<8x128xf32>
    tpu.vector_store %arg9[%c0_48, %c0_49], %56 {strides = array<i32>} : memref<8x128xf32, #tpu.memory_space<vmem>>, vector<8x128xf32>,
    return
  }
}

</mosaic_0001>

<bundles_post_ra>
// kernel: gcn_forward_fused.1
= control target key start
LH: loop header
LB: loop body
LE: loop exit
PB: predicated region body
PF: predicated region fallthrough
CT: control target
= control target key end

     0   :  { %14 = vsyncpa [#allocation3], 0  ;;  %s3658_s0 = inlined_call_operand.hbm [shape: bf16[2,256,256], index: 0, kind: input, shape index: {}]   ;;  %s3659_s1 = inlined_call_operand.vmem [shape: f32[8,256], index: 1, kind: input, shape index: {}]   ;;  %s3660_s2 = inlined_call_operand.vmem [shape: bf16[256,8], index: 2, kind: input, shape index: {}]   ;;  %s3661_s3 = inlined_call_operand.vmem [shape: bf16[8,128], index: 3, kind: input, shape index: {}]   ;;  %s3662_s4 = inlined_call_operand.vmem [shape: f32[1,128], index: 4, kind: input, shape index: {}]   ;;  %s3663_s5 = inlined_call_operand.vmem [shape: bf16[2,128,128], index: 5, kind: input, shape index: {}]   ;;  %s3664_s6 = inlined_call_operand.vmem [shape: f32[1,128], index: 6, kind: input, shape index: {}]   ;;  %s3665_s7 = inlined_call_operand.hbm [shape: f32[2,128,128], index: 7, kind: input, shape index: {}]   ;;  %s3666_s8 = inlined_call_operand.vmem [shape: f32[1,128], index: 8, kind: input, shape index: {}]   ;;  %s3667_s9 = inlined_call_operand.hbm [shape: f32[8,128], index: 9, kind: output, shape index: {}]  }
   0x1   :  { %15 = vsyncpa [#allocation6], 0 }
   0x2   :  { %16 = vsyncpa [#allocation4], 0  ;;  %s21_s11 = sshll.u32 %s3658_s0, 4  ;;  %s2703_s12 = smov [#allocation2]   ;;  %s22_s11 = int_to_ptr.hbm [resolvable:$true] %s21_s11 }
   0x3   :  { %s23_s13 = sshll.u32 %s2703_s12, 4  ;;  %s46_s16 = sshll.u32 %s3665_s7, 4  ;;  %s24_s13 = int_to_ptr.vmem [resolvable:$true] %s23_s13  ;;  %s47_s16 = int_to_ptr.hbm [resolvable:$true] %s46_s16 }
   0x4   :  { %s2704_s17 = smov 128   ;;  %s2705_s18 = smov 8  }
   0x5   :  { %29 = dma.hbm_to_vmem [thread:$0]  %s22_s11, 8192, %s24_s13, [#allocation3], %s2704_s17, %s2704_s17, %s2705_s18  }
   0x6   :  { %s2706_s19 = smov [#allocation5]  }
   0x7   :  { %s48_s20 = sshll.u32 %s2706_s19, 4  ;;  %s49_s20 = int_to_ptr.vmem [resolvable:$true] %s48_s20 }
   0x8   :  { %54 = dma.hbm_to_vmem [thread:$0]  %s47_s16, 4096, %s49_s20, [#allocation6], %s2704_s17, %s2704_s17, %s2705_s18  }
   0x9   :  { %2697 = dma.done.wait [#allocation3], 8192  }
   0xa   :  { %2698 = vsyncadd [#allocation3], 4294959104 }
   0xb   :  { %2699 = dma.done.wait [#allocation6], 4096  }
   0xc   :  { %2700 = vsyncadd [#allocation6], 4294963200  ;;  %vm228_vm0 = vcmask 1043456   ;;  %v98_v0 = vld [vmem:[%s3661_s3] sm:$0xf]  ;;  %vm179_vm1 = vcmask 64512  }
   0xd   :  { %v230_v1 = vsel %vm228_vm0, %v98_v0, 0  ;;  %v2520_v2 = vld [vmem:[%s3660_s2] sm:$0xff]  ;;  %v2521_v3 = vld [vmem:[%s3660_s2 + $0x8] sm:$0xff]  ;;  %v2522_v4 = vld [vmem:[%s3660_s2 + $0x10] sm:$0xff]  ;;  %s2707_s0 = smov [#allocation7]   ;;  %s2093_s23 = sshll.u32 %s3667_s9, 4  ;;  %s2094_s23 = int_to_ptr.hbm [resolvable:$true] %s2093_s23 }
   0xe   :  { %239 = vmatpush.bf16.msra.mxu0 %v230_v1  ;;  %v2523_v5 = vld [vmem:[%s3660_s2 + $0x18] sm:$0xff]  ;;  %v2524_v6 = vld [vmem:[%s3660_s2 + $0x20] sm:$0xff]  ;;  %v2525_v7 = vld [vmem:[%s3660_s2 + $0x28] sm:$0xff]  ;;  %s2091_s21 = sshll.u32 %s2707_s0, 4  ;;  %s2092_s21 = int_to_ptr.vmem [resolvable:$true] %s2091_s21 }
   0xf   :  { %v2526_v8 = vld [vmem:[%s3660_s2 + $0x30] sm:$0xff]  ;;  %v2527_v9 = vld [vmem:[%s3660_s2 + $0x38] sm:$0xff]  ;;  %v2528_v10 = vld [vmem:[%s3660_s2 + $0x40] sm:$0xff] }
  0x10   :  { %v2529_v14 = vld [vmem:[%s3660_s2 + $0x48] sm:$0xff]  ;;  %v2530_v18 = vld [vmem:[%s3660_s2 + $0x50] sm:$0xff]  ;;  %v2531_v22 = vld [vmem:[%s3660_s2 + $0x58] sm:$0xff] }
  0x11   :  { %2168 = vmatmul.msk.bf16.vlgmr.msra.gmra.mxu0 %vm179_vm1, %v2520_v2  ;;  %v2532_v26 = vld [vmem:[%s3660_s2 + $0x60] sm:$0xff]  ;;  %v2533_v29 = vld [vmem:[%s3660_s2 + $0x68] sm:$0xff]  ;;  %v2534_v32 = vld [vmem:[%s3660_s2 + $0x70] sm:$0xff] }
  0x12   :  { %v2535_v35 = vld [vmem:[%s3660_s2 + $0x78] sm:$0xff]  ;;  %v2186_v56 = vld [vmem:[#allocation2] sm:$0xf]  ;;  %v2537_v57 = vld [vmem:[#allocation2 + $0x4] sm:$0xf0] }
  0x13   :  { %v2833_v58 = vor.u32 %v2537_v57, %v2186_v56  ;;  %v2194_v62 = vld [vmem:[#allocation2 + $0x10] sm:$0xf]  ;;  %v2539_v63 = vld [vmem:[#allocation2 + $0x14] sm:$0xf0]  ;;  %v2324_v56 = vld [vmem:[#allocation2 + $0x118] sm:$0xf0] }
  0x14   :  { %v2836_v0 = vor.u32 %v2539_v63, %v2194_v62  ;;  %v2236_v62 = vld [vmem:[#allocation2 + $0x68] sm:$0xf0] }
  0x21   :  { %2169 = vmatmul.msk.bf16.gmra.mxu0 %vm179_vm1, %v2521_v3 }
  0x31   :  { %2170 = vmatmul.msk.bf16.gmra.mxu0 %vm179_vm1, %v2522_v4 }
  0x41   :  { %2171 = vmatmul.msk.bf16.gmra.mxu0 %vm179_vm1, %v2523_v5  ;;  %v2202_v5 = vld [vmem:[#allocation2 + $0x20] sm:$0xf] }
  0x51   :  { %2172 = vmatmul.msk.bf16.gmra.mxu0 %vm179_vm1, %v2524_v6  ;;  %v2541_v6 = vld [vmem:[#allocation2 + $0x24] sm:$0xf0] }
  0x61   :  { %2173 = vmatmul.msk.bf16.gmra.mxu0 %vm179_vm1, %v2525_v7  ;;  %v2839_v7 = vor.u32 %v2541_v6, %v2202_v5  ;;  %v2258_v6 = vld [vmem:[#allocation2 + $0x90] sm:$0xf] }
  0x71   :  { %2174 = vmatmul.msk.bf16.gmra.mxu0 %vm179_vm1, %v2526_v8 }
  0x81   :  { %2175 = vmatmul.msk.bf16.gmra.mxu0 %vm179_vm1, %v2527_v9 }
  0x8e   :  { %v241_v11 = vpop.f32.mrf.mxu0 }
  0x91   :  { %2176 = vmatmul.msk.bf16.gmra.mxu0 %vm179_vm1, %v2528_v10  ;;  %v2536_v10 = vld [vmem:[#allocation2 + $0x4] sm:$0xf] }
  0x96   :  { %v243_v12 = vpop.f32.mrf.mxu0 }
  0x97   :  { %v321_v13 = vpack.c.bf16 %v243_v12, %v241_v11  ;;  %v2188_v11 = vld [vmem:[#allocation2 + $0x8] sm:$0xf0] }
  0x9e   :  { %v246_v15 = vpop.f32.mrf.mxu0 }
  0xa1   :  { %2177 = vmatmul.msk.bf16.gmra.mxu0 %vm179_vm1, %v2529_v14  ;;  %v2210_v14 = vld [vmem:[#allocation2 + $0x30] sm:$0xf] }
  0xa6   :  { %v248_v16 = vpop.f32.mrf.mxu0 }
  0xa7   :  { %v322_v17 = vpack.c.bf16 %v248_v16, %v246_v15  ;;  %v2543_v15 = vld [vmem:[#allocation2 + $0x34] sm:$0xf0] }
  0xa8   :  { %v2846_v16 = vor.u32 %v2543_v15, %v2210_v14  ;;  %v2550_v14 = vld [vmem:[#allocation2 + $0x74] sm:$0xf]  ;;  %v2244_v15 = vld [vmem:[#allocation2 + $0x78] sm:$0xf0] }
  0xae   :  { %v251_v19 = vpop.f32.mrf.mxu0 }
  0xb1   :  { %2178 = vmatmul.msk.bf16.gmra.mxu0 %vm179_vm1, %v2530_v18  ;;  %v2196_v18 = vld [vmem:[#allocation2 + $0x18] sm:$0xf0] }
  0xb6   :  { %v253_v20 = vpop.f32.mrf.mxu0 }
  0xb7   :  { %v323_v21 = vpack.c.bf16 %v253_v20, %v251_v19  ;;  %v2218_v20 = vld [vmem:[#allocation2 + $0x40] sm:$0xf] }
  0xbe   :  { %v256_v23 = vpop.f32.mrf.mxu0 }
  0xc1   :  { %2179 = vmatmul.msk.bf16.gmra.mxu0 %vm179_vm1, %v2531_v22 }
  0xc6   :  { %v258_v24 = vpop.f32.mrf.mxu0 }
  0xc7   :  { %v324_v25 = vpack.c.bf16 %v258_v24, %v256_v23  ;;  %v2540_v23 = vld [vmem:[#allocation2 + $0x24] sm:$0xf]  ;;  %v2204_v24 = vld [vmem:[#allocation2 + $0x28] sm:$0xf0] }
  0xce   :  { %v261_v27 = vpop.f32.mrf.mxu0 }
  0xd1   :  { %2180 = vmatmul.msk.bf16.gmra.mxu0 %vm179_vm1, %v2532_v26  ;;  %v2226_v26 = vld [vmem:[#allocation2 + $0x50] sm:$0xf] }
  0xd6   :  { %v263_v28 = vpop.f32.mrf.mxu0 }
  0xd7   :  { %v325_v42 = vpack.c.bf16 %v263_v28, %v261_v27  ;;  %v2547_v27 = vld [vmem:[#allocation2 + $0x54] sm:$0xf0] }
  0xd8   :  { %v2858_v28 = vor.u32 %v2547_v27, %v2226_v26  ;;  %v2266_v26 = vld [vmem:[#allocation2 + $0xa0] sm:$0xf]  ;;  %v2557_v27 = vld [vmem:[#allocation2 + $0xa4] sm:$0xf0] }
  0xde   :  { %v266_v30 = vpop.f32.mrf.mxu0 }
  0xe1   :  { %2181 = vmatmul.msk.bf16.gmra.mxu0 %vm179_vm1, %v2533_v29  ;;  %v2542_v29 = vld [vmem:[#allocation2 + $0x34] sm:$0xf] }
  0xe6   :  { %v268_v31 = vpop.f32.mrf.mxu0 }
  0xe7   :  { %v326_v41 = vpack.c.bf16 %v268_v31, %v266_v30  ;;  %v2212_v30 = vld [vmem:[#allocation2 + $0x38] sm:$0xf0] }
  0xe8   :  { %v2861_v31 = vor.u32 %v2542_v29, %v2212_v30  ;;  %v2913_v29 = vor.u32 %v2557_v27, %v2266_v26  ;;  %v2574_v30 = vld [vmem:[#allocation2 + $0x134] sm:$0xf] }
  0xee   :  { %v271_v33 = vpop.f32.mrf.mxu0 }
  0xf1   :  { %2182 = vmatmul.msk.bf16.gmra.mxu0 %vm179_vm1, %v2534_v32  ;;  %v2234_v32 = vld [vmem:[#allocation2 + $0x60] sm:$0xf] }
  0xf6   :  { %v273_v34 = vpop.f32.mrf.mxu0 }
  0xf7   :  { %v327_v39 = vpack.c.bf16 %v273_v34, %v271_v33  ;;  %v2549_v33 = vld [vmem:[#allocation2 + $0x64] sm:$0xf0] }
  0xf8   :  { %v2864_v34 = vor.u32 %v2549_v33, %v2234_v32  ;;  %v2340_v32 = vld [vmem:[#allocation2 + $0x138] sm:$0xf0] }
  0xf9   :  { %v2916_v33 = vor.u32 %v2574_v30, %v2340_v32 }
  0xfe   :  { %v276_v36 = vpop.f32.mrf.mxu0 }
 0x101   :  { %2183 = vmatmul.msk.bf16.gmra.mxu0 %vm179_vm1, %v2535_v35  ;;  %v2544_v35 = vld [vmem:[#allocation2 + $0x44] sm:$0xf] }
 0x106   :  { %v278_v37 = vpop.f32.mrf.mxu0 }
 0x107   :  { %v328_v38 = vpack.c.bf16 %v278_v37, %v276_v36  ;;  %v2220_v36 = vld [vmem:[#allocation2 + $0x48] sm:$0xf0] }
 0x108   :  { %v2867_v37 = vor.u32 %v2544_v35, %v2220_v36  ;;  %v2552_v35 = vld [vmem:[#allocation2 + $0x84] sm:$0xf]  ;;  %v2252_v36 = vld [vmem:[#allocation2 + $0x88] sm:$0xf0] }
 0x109   :  { %533 = vmatpush.bf16.msra.mxu1 %v328_v38  ;;  %952 = vmatpush.bf16.msra.mxu3 %v328_v38  ;;  %v2314_v38 = vld [vmem:[#allocation2 + $0x100] sm:$0xf] }
 0x10a   :  { %3702 = vst [vmem:[#allocation11_spill] sm:$0xff] %v2867_v37 }
 0x10d   :  { %534 = vmatpush.bf16.msra.mxu1 %v327_v39  ;;  %953 = vmatpush.bf16.msra.mxu3 %v327_v39  ;;  %v2569_v39 = vld [vmem:[#allocation2 + $0x104] sm:$0xf0] }
 0x10e   :  { %v2831_v40 = vpop.f32.mrf.mxu0 }
 0x111   :  { %535 = vmatpush.bf16.msra.mxu1 %v326_v41  ;;  %954 = vmatpush.bf16.msra.mxu3 %v326_v41  ;;  %v2242_v41 = vld [vmem:[#allocation2 + $0x70] sm:$0xf] }
 0x115   :  { %536 = vmatpush.bf16.msra.mxu1 %v325_v42  ;;  %955 = vmatpush.bf16.msra.mxu3 %v325_v42  ;;  %v2551_v42 = vld [vmem:[#allocation2 + $0x74] sm:$0xf0] }
 0x116   :  { %v283_v43 = vpop.f32.mrf.mxu0 }
 0x117   :  { %v329_v12 = vpack.c.bf16 %v283_v43, %v2831_v40  ;;  %v2870_v40 = vor.u32 %v2569_v39, %v2314_v38  ;;  %v2568_v43 = vld [vmem:[#allocation2 + $0x104] sm:$0xf]  ;;  %v2924_v39 = vld [vmem:[%s3662_s4] ss:$0 sm:$0xff] }
 0x119   :  { %537 = vmatpush.bf16.msra.mxu1 %v324_v25  ;;  %956 = vmatpush.bf16.msra.mxu3 %v324_v25  ;;  %v2855_v25 = vor.u32 %v2540_v23, %v2204_v24 }
 0x11d   :  { %538 = vmatpush.bf16.msra.mxu1 %v323_v21  ;;  %957 = vmatpush.bf16.msra.mxu3 %v323_v21  ;;  %v2545_v21 = vld [vmem:[#allocation2 + $0x44] sm:$0xf0] }
 0x11e   :  { %v286_v44 = vpop.f32.mrf.mxu0  ;;  %v2852_v22 = vor.u32 %v2545_v21, %v2218_v20  ;;  %v2338_v20 = vld [vmem:[#allocation2 + $0x130] sm:$0xf]  ;;  %v2575_v21 = vld [vmem:[#allocation2 + $0x134] sm:$0xf0] }
 0x11f   :  { %v2908_v23 = vor.u32 %v2575_v21, %v2338_v20  ;;  %v2354_v20 = vld [vmem:[#allocation2 + $0x150] sm:$0xf]  ;;  %v2579_v21 = vld [vmem:[#allocation2 + $0x154] sm:$0xf0] }
 0x120   :  { %v2950_v30 = vor.u32 %v2579_v21, %v2354_v20 }
 0x121   :  { %539 = vmatpush.bf16.msra.mxu1 %v322_v17  ;;  %958 = vmatpush.bf16.msra.mxu3 %v322_v17  ;;  %v2538_v17 = vld [vmem:[#allocation2 + $0x14] sm:$0xf] }
 0x122   :  { %v2849_v19 = vor.u32 %v2538_v17, %v2196_v18  ;;  %v2905_v18 = vor.u32 %v2550_v14, %v2244_v15 }
 0x124   :  { %3705 = vst [vmem:[#allocation14_spill] sm:$0xff] %v2905_v18 }
 0x125   :  { %540 = vmatpush.bf16.msra.mxu1 %v321_v13  ;;  %959 = vmatpush.bf16.msra.mxu3 %v321_v13  ;;  %v2843_v13 = vor.u32 %v2536_v10, %v2188_v11  ;;  %v2572_v10 = vld [vmem:[#allocation2 + $0x124] sm:$0xf]  ;;  %v2332_v11 = vld [vmem:[#allocation2 + $0x128] sm:$0xf0] }
 0x126   :  { %v288_v45 = vpop.f32.mrf.mxu0 }
 0x127   :  { %v330_v9 = vpack.c.bf16 %v288_v45, %v286_v44  ;;  %v2316_v44 = vld [vmem:[#allocation2 + $0x108] sm:$0xf0]  ;;  %v2873_v45 = vor.u32 %v2551_v42, %v2242_v41  ;;  %v2926_v41 = vor.u32 %v2552_v35, %v2252_v36  ;;  %v2346_v42 = vld [vmem:[#allocation2 + $0x140] sm:$0xf]  ;;  %v2561_v36 = vld [vmem:[#allocation2 + $0xc4] sm:$0xf0] }
 0x128   :  { %541 = vmatmul.bf16.vlgmr.msra.gmra.mxu1 %v2833_v58  ;;  %960 = vmatmul.bf16.vlgmr.msra.gmra.mxu3 %v2870_v40  ;;  %v2282_v35 = vld [vmem:[#allocation2 + $0xc0] sm:$0xf] }
 0x129   :  { %3706 = vst [vmem:[#allocation15_spill] sm:$0xff] %v2926_v41 }
 0x12e   :  { %v291_v46 = vpop.f32.mrf.mxu0 }
 0x136   :  { %v293_v47 = vpop.f32.mrf.mxu0 }
 0x137   :  { %v331_v8 = vpack.c.bf16 %v293_v47, %v291_v46  ;;  %v2875_v46 = vor.u32 %v2568_v43, %v2316_v44  ;;  %v2546_v47 = vld [vmem:[#allocation2 + $0x54] sm:$0xf]  ;;  %v2577_v43 = vld [vmem:[#allocation2 + $0x144] sm:$0xf0] }
 0x138   :  { %546 = vmatmul.bf16.gmra.mxu1 %v2836_v0 }
 0x13e   :  { %v296_v48 = vpop.f32.mrf.mxu0 }
 0x146   :  { %v298_v49 = vpop.f32.mrf.mxu0 }
 0x147   :  { %v332_v4 = vpack.c.bf16 %v298_v49, %v296_v48  ;;  %v2228_v48 = vld [vmem:[#allocation2 + $0x58] sm:$0xf0] }
 0x148   :  { %551 = vmatmul.bf16.gmra.mxu1 %v2839_v7  ;;  %v2879_v49 = vor.u32 %v2546_v47, %v2228_v48  ;;  %v2930_v47 = vor.u32 %v2577_v43, %v2346_v42  ;;  %v2955_v43 = vor.u32 %v2561_v36, %v2282_v35  ;;  %v2563_v35 = vld [vmem:[#allocation2 + $0xd4] sm:$0xf0] }
 0x14a   :  { %3703 = vst [vmem:[#allocation12_spill] sm:$0xff] %v2879_v49 }
 0x14b   :  { %3710 = vst [vmem:[#allocation19_spill] sm:$0xff] %v2955_v43 }
 0x14e   :  { %v301_v50 = vpop.f32.mrf.mxu0 }
 0x156   :  { %v303_v51 = vpop.f32.mrf.mxu0 }
 0x157   :  { %v333_v3 = vpack.c.bf16 %v303_v51, %v301_v50  ;;  %v2322_v50 = vld [vmem:[#allocation2 + $0x110] sm:$0xf]  ;;  %v2571_v51 = vld [vmem:[#allocation2 + $0x114] sm:$0xf0] }
 0x158   :  { %556 = vmatmul.bf16.gmra.mxu1 %v2846_v16 }
 0x15e   :  { %v306_v52 = vpop.f32.mrf.mxu0 }
 0x166   :  { %v308_v53 = vpop.f32.mrf.mxu0 }
 0x167   :  { %v334_v2 = vpack.c.bf16 %v308_v53, %v306_v52  ;;  %v2882_v52 = vor.u32 %v2571_v51, %v2322_v50  ;;  %v2250_v53 = vld [vmem:[#allocation2 + $0x80] sm:$0xf]  ;;  %v2274_v51 = vld [vmem:[#allocation2 + $0xb0] sm:$0xf] }
 0x168   :  { %561 = vmatmul.bf16.gmra.mxu1 %v2852_v22 }
 0x169   :  { %965 = vmatmul.bf16.gmra.mxu3 %v2882_v52 }
 0x16e   :  { %v311_v54 = vpop.f32.mrf.mxu0 }
 0x176   :  { %v313_v55 = vpop.f32.mrf.mxu0 }
 0x177   :  { %v335_v1 = vpack.c.bf16 %v313_v55, %v311_v54  ;;  %v2553_v54 = vld [vmem:[#allocation2 + $0x84] sm:$0xf0]  ;;  %v2570_v55 = vld [vmem:[#allocation2 + $0x114] sm:$0xf] }
 0x178   :  { %566 = vmatmul.bf16.gmra.mxu1 %v2858_v28  ;;  %v2885_v57 = vor.u32 %v2553_v54, %v2250_v53  ;;  %v2559_v53 = vld [vmem:[#allocation2 + $0xb4] sm:$0xf0] }
 0x17e   :  { %v316_v59 = vpop.f32.mrf.mxu0 }
 0x186   :  { %v318_v60 = vpop.f32.mrf.mxu0 }
 0x187   :  { %v336_v61 = vpack.c.bf16 %v318_v60, %v316_v59  ;;  %v2887_v59 = vor.u32 %v2570_v55, %v2324_v56  ;;  %v2935_v55 = vor.u32 %v2559_v53, %v2274_v51  ;;  %v2576_v56 = vld [vmem:[#allocation2 + $0x144] sm:$0xf]  ;;  %v2268_v53 = vld [vmem:[#allocation2 + $0xa8] sm:$0xf0] }
 0x188   :  { %571 = vmatmul.bf16.gmra.mxu1 %v2864_v34  ;;  %v2556_v51 = vld [vmem:[#allocation2 + $0xa4] sm:$0xf] }
 0x189   :  { %622 = vmatpush.bf16.msra.mxu2 %v336_v61  ;;  %1041 = vmatpush.bf16.msrb.mxu0 %v336_v61  ;;  %v2548_v61 = vld [vmem:[#allocation2 + $0x64] sm:$0xf]  ;;  %3707 = vst [vmem:[#allocation16_spill] sm:$0xff] %v2935_v55 }
 0x18d   :  { %623 = vmatpush.bf16.msra.mxu2 %v335_v1  ;;  %1042 = vmatpush.bf16.msrb.mxu0 %v335_v1  ;;  %v2891_v1 = vor.u32 %v2548_v61, %v2236_v62  ;;  %v2348_v61 = vld [vmem:[#allocation2 + $0x148] sm:$0xf0] }
 0x18e   :  { %v2938_v62 = vor.u32 %v2576_v56, %v2348_v61 }
 0x18f   :  { %3704 = vst [vmem:[#allocation13_spill] sm:$0xff] %v2891_v1 }
 0x190   :  { %3708 = vst [vmem:[#allocation17_spill] sm:$0xff] %v2938_v62 }
 0x191   :  { %624 = vmatpush.bf16.msra.mxu2 %v334_v2  ;;  %1043 = vmatpush.bf16.msrb.mxu0 %v334_v2  ;;  %v2330_v2 = vld [vmem:[#allocation2 + $0x120] sm:$0xf] }
 0x195   :  { %625 = vmatpush.bf16.msra.mxu2 %v333_v3  ;;  %1044 = vmatpush.bf16.msrb.mxu0 %v333_v3  ;;  %v2573_v3 = vld [vmem:[#allocation2 + $0x124] sm:$0xf0] }
 0x198   :  { %576 = vmatmul.bf16.gmra.mxu1 %v2873_v45 }
 0x199   :  { %626 = vmatpush.bf16.msra.mxu2 %v332_v4  ;;  %1045 = vmatpush.bf16.msrb.mxu0 %v332_v4  ;;  %v2894_v4 = vor.u32 %v2573_v3, %v2330_v2  ;;  %v2260_v2 = vld [vmem:[#allocation2 + $0x98] sm:$0xf0] }
 0x19b   :  { %970 = vmatmul.bf16.gmra.mxu3 %v2894_v4 }
 0x19d   :  { %627 = vmatpush.bf16.msra.mxu2 %v331_v8  ;;  %1046 = vmatpush.bf16.msrb.mxu0 %v331_v8  ;;  %v2555_v8 = vld [vmem:[#allocation2 + $0x94] sm:$0xf0] }
 0x1a1   :  { %628 = vmatpush.bf16.msra.mxu2 %v330_v9  ;;  %1047 = vmatpush.bf16.msrb.mxu0 %v330_v9  ;;  %v2897_v9 = vor.u32 %v2555_v8, %v2258_v6 }
 0x1a5   :  { %629 = vmatpush.bf16.msra.mxu2 %v329_v12  ;;  %1048 = vmatpush.bf16.msrb.mxu0 %v329_v12  ;;  %v542_v60 = vpop.f32.mrf.mxu1  ;;  %v2900_v12 = vor.u32 %v2572_v10, %v2332_v11 }
 0x1a6   :  { %v543_v44 = vadd.f32 %v2924_v39, %v542_v60  ;;  %v2554_v60 = vld [vmem:[#allocation2 + $0x94] sm:$0xf] }
 0x1a7   :  { %v2944_v11 = vor.u32 %v2554_v60, %v2260_v2  ;;  %v2965_v2 = vor.u32 %v2556_v51, %v2268_v53  ;;  %v2558_v51 = vld [vmem:[#allocation2 + $0xb4] sm:$0xf]  ;;  %v2276_v53 = vld [vmem:[#allocation2 + $0xb8] sm:$0xf0] }
 0x1a8   :  { %630 = vmatmul.bf16.vlgmr.msra.gmra.mxu2 %v2843_v13  ;;  %1049 = vmatmul.bf16.vlgmr.msrb.gmra.mxu0 %v2875_v46 }
 0x1a9   :  { %581 = vmatmul.bf16.gmra.mxu1 %v2885_v57  ;;  %3709 = vst [vmem:[#allocation18_spill] sm:$0xff] %v2944_v11 }
 0x1aa   :  { %3712 = vst [vmem:[#allocation21_spill] sm:$0xff] %v2965_v2 }
 0x1ab   :  { %975 = vmatmul.bf16.gmra.mxu3 %v2908_v23 }
 0x1ad   :  { %v544_v63 = vpop.f32.mrf.mxu1 }
 0x1ae   :  { %v545_v3 = vadd.f32 %v2924_v39, %v544_v63 }
 0x1b5   :  { %v547_v5 = vpop.f32.mrf.mxu1 }
 0x1b6   :  { %v548_v26 = vadd.f32 %v2924_v39, %v547_v5  ;;  %v2356_v5 = vld [vmem:[#allocation2 + $0x158] sm:$0xf0] }
 0x1b8   :  { %635 = vmatmul.bf16.gmra.mxu2 %v2849_v19  ;;  %1054 = vmatmul.bf16.gmra.mxu0 %v2887_v59 }
 0x1b9   :  { %586 = vmatmul.bf16.gmra.mxu1 %v2897_v9 }
 0x1bb   :  { %980 = vmatmul.bf16.gmra.mxu3 %v2930_v47 }
 0x1bd   :  { %v2903_v17 = vpop.f32.mrf.mxu1 }
 0x1c5   :  { %v2911_v24 = vpop.f32.mrf.mxu1 }
 0x1c8   :  { %640 = vmatmul.bf16.gmra.mxu2 %v2855_v25  ;;  %1059 = vmatmul.bf16.gmra.mxu0 %v2900_v12 }
 0x1c9   :  { %591 = vmatmul.bf16.gmra.mxu1 %v2913_v29 }
 0x1cb   :  { %985 = vmatmul.bf16.gmra.mxu3 %v2950_v30 }
 0x1cd   :  { %v2919_v38 = vpop.f32.mrf.mxu1 }
 0x1d5   :  { %v2933_v50 = vpop.f32.mrf.mxu1 }
 0x1d8   :  { %645 = vmatmul.bf16.gmra.mxu2 %v2861_v31  ;;  %1064 = vmatmul.bf16.gmra.mxu0 %v2916_v33 }
 0x1d9   :  { %596 = vmatmul.bf16.gmra.mxu1 %v2935_v55 }
 0x1dd   :  { %v2942_v8 = vpop.f32.mrf.mxu1 }
 0x1e5   :  { %v2953_v32 = vpop.f32.mrf.mxu1 }
 0x1e8   :  { %650 = vmatmul.bf16.gmra.mxu2 %v2867_v37  ;;  %1069 = vmatmul.bf16.gmra.mxu0 %v2938_v62 }
 0x1e9   :  { %601 = vmatmul.bf16.gmra.mxu1 %v2955_v43  ;;  %v2394_v43 = vld [vmem:[#allocation2 + $0x1a0] sm:$0xf] }
 0x1ed   :  { %v2963_v61 = vpop.f32.mrf.mxu1 }
 0x1f8   :  { %655 = vmatmul.bf16.gmra.mxu2 %v2879_v49 }
 0x208   :  { %660 = vmatmul.bf16.gmra.mxu2 %v2891_v1 }
 0x218   :  { %665 = vmatmul.bf16.gmra.mxu2 %v2905_v18 }
 0x228   :  { %670 = vmatmul.bf16.gmra.mxu2 %v2926_v41  ;;  %v563_v41 = vadd.f32 %v2924_v39, %v2953_v32  ;;  %v2606_v32 = vld [vmem:[%s3663_s5 + $0x30] sm:$0xff] }
 0x22b   :  { %v631_v48 = vpop.f32.mrf.mxu2 }
 0x22c   :  { %v632_v54 = vadd.f32 %v631_v48, %v543_v44  ;;  %v2578_v44 = vld [vmem:[#allocation2 + $0x154] sm:$0xf] }
 0x22d   :  { %v2958_v48 = vor.u32 %v2578_v44, %v2356_v5  ;;  %v2580_v44 = vld [vmem:[#allocation2 + $0x164] sm:$0xf] }
 0x22e   :  { %v711_v14 = vmax.f32 %v632_v54, 0.0  ;;  %v550_v54 = vadd.f32 %v2924_v39, %v2903_v17 }
 0x22f   :  { %3711 = vst [vmem:[#allocation20_spill] sm:$0xff] %v2958_v48  ;;  %1074 = vmatmul.bf16.gmra.mxu0 %v2958_v48  ;;  %v2589_v48 = vld [vmem:[#allocation2 + $0x1a4] sm:$0xf0] }
 0x233   :  { %v633_v6 = vpop.f32.mrf.mxu2 }
 0x234   :  { %v634_v10 = vadd.f32 %v633_v6, %v545_v3 }
 0x236   :  { %v712_v15 = vmax.f32 %v634_v10, 0.0  ;;  %v2362_v10 = vld [vmem:[#allocation2 + $0x160] sm:$0xf] }
 0x238   :  { %v2947_v27 = vpack.c.bf16 %v712_v15, %v711_v14  ;;  %675 = vmatmul.bf16.gmra.mxu2 %v2944_v11  ;;  %v2581_v14 = vld [vmem:[#allocation2 + $0x164] sm:$0xf0]  ;;  %v553_v15 = vadd.f32 %v2924_v39, %v2911_v24  ;;  %v2364_v24 = vld [vmem:[#allocation2 + $0x168] sm:$0xf0]  ;;  %v2378_v11 = vld [vmem:[#allocation2 + $0x180] sm:$0xf] }
 0x239   :  { %v2970_v20 = vor.u32 %v2581_v14, %v2362_v10  ;;  %v2980_v5 = vor.u32 %v2580_v44, %v2364_v24 }
 0x23b   :  { %v636_v63 = vpop.f32.mrf.mxu2  ;;  %990 = vmatmul.bf16.gmra.mxu3 %v2970_v20  ;;  %3714 = vst [vmem:[#allocation23_spill] sm:$0xff] %v2980_v5 }
 0x23c   :  { %v637_v42 = vadd.f32 %v636_v63, %v548_v26  ;;  %v2975_v26 = vpop.f32.mrf.mxu1  ;;  %v2290_v63 = vld [vmem:[#allocation2 + $0xd0] sm:$0xf] }
 0x23e   :  { %v713_v3 = vmax.f32 %v637_v42, 0.0  ;;  %v2977_v42 = vor.u32 %v2563_v35, %v2290_v63  ;;  %v558_v63 = vadd.f32 %v2924_v39, %v2933_v50  ;;  %v2615_v50 = vld [vmem:[%s3663_s5 + $0x78] sm:$0xff] }
 0x23f   :  { %1079 = vmatmul.bf16.gmra.mxu0 %v2980_v5  ;;  %1259 = vmatpush.bf16.msrb.mxu1 %v2615_v50  ;;  %v2613_v50 = vld [vmem:[%s3663_s5 + $0x68] sm:$0xff] }
 0x240   :  { %3713 = vst [vmem:[#allocation22_spill] sm:$0xff] %v2977_v42  ;;  %606 = vmatmul.bf16.gmra.mxu1 %v2977_v42 }
 0x243   :  { %v638_v56 = vpop.f32.mrf.mxu2 }
 0x244   :  { %v639_v60 = vadd.f32 %v638_v56, %v550_v54  ;;  %v555_v54 = vadd.f32 %v2924_v39, %v2919_v38 }
 0x246   :  { %v714_v6 = vmax.f32 %v639_v60, 0.0  ;;  %v2985_v60 = vpop.f32.mrf.mxu1 }
 0x248   :  { %680 = vmatmul.bf16.gmra.mxu2 %v2965_v2  ;;  %v2972_v21 = vpack.c.bf16 %v714_v6, %v713_v3  ;;  %v2987_v6 = vor.u32 %v2558_v51, %v2276_v53  ;;  %v2298_v51 = vld [vmem:[#allocation2 + $0xe0] sm:$0xf]  ;;  %v2565_v53 = vld [vmem:[#allocation2 + $0xe4] sm:$0xf0]  ;;  %v2607_v2 = vld [vmem:[%s3663_s5 + $0x38] sm:$0xff] }
 0x249   :  { %1396 = vmatpush.bf16.msrb.mxu2 %v2607_v2  ;;  %v961_v2 = vpop.f32.mrf.mxu3 }
 0x24a   :  { %3715 = vst [vmem:[#allocation24_spill] sm:$0xff] %v2987_v6 }
 0x24b   :  { %v641_v17 = vpop.f32.mrf.mxu2 }
 0x24c   :  { %v642_v36 = vadd.f32 %v641_v17, %v553_v15  ;;  %v2370_v15 = vld [vmem:[#allocation2 + $0x170] sm:$0xf]  ;;  %v2583_v17 = vld [vmem:[#allocation2 + $0x174] sm:$0xf0] }
 0x24d   :  { %v2992_v35 = vor.u32 %v2583_v17, %v2370_v15  ;;  %v2284_v15 = vld [vmem:[#allocation2 + $0xc8] sm:$0xf0]  ;;  %v2614_v17 = vld [vmem:[%s3663_s5 + $0x70] sm:$0xff]  ;;  %1397 = vmatpush.bf16.msrb.mxu2 %v2606_v32  ;;  %v2292_v32 = vld [vmem:[#allocation2 + $0xd8] sm:$0xf0] }
 0x24e   :  { %v715_v10 = vmax.f32 %v642_v36, 0.0  ;;  %v2997_v24 = vpop.f32.mrf.mxu1  ;;  %1260 = vmatpush.bf16.msrb.mxu1 %v2614_v17 }
 0x24f   :  { %995 = vmatmul.bf16.gmra.mxu3 %v2992_v35 }
 0x252   :  { %1261 = vmatpush.bf16.msrb.mxu1 %v2613_v50 }
 0x253   :  { %v643_v56 = vpop.f32.mrf.mxu2 }
 0x254   :  { %v644_v3 = vadd.f32 %v643_v56, %v555_v54  ;;  %v2999_v54 = vor.u32 %v2565_v53, %v2298_v51  ;;  %v2582_v56 = vld [vmem:[#allocation2 + $0x174] sm:$0xf] }
 0x256   :  { %v716_v14 = vmax.f32 %v644_v3, 0.0  ;;  %3716 = vst [vmem:[#allocation25_spill] sm:$0xff] %v2999_v54  ;;  %611 = vmatmul.bf16.gmra.mxu1 %v2999_v54  ;;  %v2372_v3 = vld [vmem:[#allocation2 + $0x178] sm:$0xf0]  ;;  %v3013_v51 = vpop.f32.mrf.mxu1 }
 0x258   :  { %685 = vmatmul.bf16.gmra.mxu2 %v2987_v6  ;;  %v2994_v44 = vpack.c.bf16 %v716_v14, %v715_v10  ;;  %v3005_v10 = vor.u32 %v2582_v56, %v2372_v3  ;;  %v2560_v14 = vld [vmem:[#allocation2 + $0xc4] sm:$0xf] }
 0x259   :  { %v3015_v6 = vor.u32 %v2560_v14, %v2284_v15 }
 0x25a   :  { %3717 = vst [vmem:[#allocation26_spill] sm:$0xff] %v3005_v10  ;;  %1084 = vmatmul.bf16.gmra.mxu0 %v3005_v10 }
 0x25b   :  { %v646_v38 = vpop.f32.mrf.mxu2  ;;  %3718 = vst [vmem:[#allocation27_spill] sm:$0xff] %v3015_v6 }
 0x25c   :  { %v647_v36 = vadd.f32 %v646_v38, %v558_v63  ;;  %v560_v63 = vadd.f32 %v2924_v39, %v2942_v8  ;;  %v2585_v8 = vld [vmem:[#allocation2 + $0x184] sm:$0xf0] }
 0x25d   :  { %v3026_v14 = vor.u32 %v2585_v8, %v2378_v11  ;;  %v2567_v11 = vld [vmem:[#allocation2 + $0xf4] sm:$0xf0]  ;;  %v2605_v8 = vld [vmem:[%s3663_s5 + $0x28] sm:$0xff] }
 0x25e   :  { %v717_v56 = vmax.f32 %v647_v36, 0.0  ;;  %v2612_v36 = vld [vmem:[%s3663_s5 + $0x60] sm:$0xff]  ;;  %1398 = vmatpush.bf16.msrb.mxu2 %v2605_v8 }
 0x25f   :  { %1000 = vmatmul.bf16.gmra.mxu3 %v3026_v14  ;;  %1262 = vmatpush.bf16.msrb.mxu1 %v2612_v36  ;;  %v2584_v36 = vld [vmem:[#allocation2 + $0x184] sm:$0xf] }
 0x263   :  { %v648_v38 = vpop.f32.mrf.mxu2 }
 0x264   :  { %v649_v53 = vadd.f32 %v648_v38, %v560_v63  ;;  %v3034_v63 = vpop.f32.mrf.mxu1  ;;  %v2306_v38 = vld [vmem:[#allocation2 + $0xf0] sm:$0xf] }
 0x265   :  { %v3039_v50 = vor.u32 %v2567_v11, %v2306_v38  ;;  %v2610_v38 = vld [vmem:[%s3663_s5 + $0x50] sm:$0xff]  ;;  %v565_v11 = vadd.f32 %v2924_v39, %v2963_v61 }
 0x266   :  { %v718_v3 = vmax.f32 %v649_v53, 0.0 }
 0x267   :  { %3719 = vst [vmem:[#allocation28_spill] sm:$0xff] %v3039_v50  ;;  %616 = vmatmul.bf16.gmra.mxu1 %v3039_v50 }
 0x268   :  { %690 = vmatmul.bf16.gmra.mxu2 %v3015_v6  ;;  %v3028_v15 = vpack.c.bf16 %v718_v3, %v717_v56  ;;  %v2611_v56 = vld [vmem:[%s3663_s5 + $0x58] sm:$0xff]  ;;  %v1050_v3 = vpop.f32.mrf.mxu0  ;;  %v2380_v6 = vld [vmem:[#allocation2 + $0x188] sm:$0xf0] }
 0x269   :  { %1263 = vmatpush.bf16.msrb.mxu1 %v2611_v56  ;;  %v3048_v54 = vor.u32 %v2584_v36, %v2380_v6  ;;  %v2604_v6 = vld [vmem:[%s3663_s5 + $0x20] sm:$0xff]  ;;  %v963_v36 = vpop.f32.mrf.mxu3 }
 0x26a   :  { %1399 = vmatpush.bf16.msrb.mxu2 %v2604_v6  ;;  %v964_v42 = vadd.f32 %v2924_v39, %v963_v36 }
 0x26b   :  { %v651_v17 = vpop.f32.mrf.mxu2  ;;  %3720 = vst [vmem:[#allocation29_spill] sm:$0xff] %v3048_v54  ;;  %1089 = vmatmul.bf16.gmra.mxu0 %v3048_v54  ;;  %v2609_v54 = vld [vmem:[%s3663_s5 + $0x48] sm:$0xff] }
 0x26c   :  { %v652_v53 = vadd.f32 %v651_v17, %v563_v41  ;;  %v962_v41 = vadd.f32 %v2924_v39, %v961_v2  ;;  %v2562_v17 = vld [vmem:[#allocation2 + $0xd4] sm:$0xf]  ;;  %v3057_v10 = vpop.f32.mrf.mxu1 }
 0x26d   :  { %1264 = vmatpush.bf16.msrb.mxu1 %v2610_v38  ;;  %v3062_v56 = vor.u32 %v2562_v17, %v2292_v32  ;;  %v568_v38 = vadd.f32 %v2924_v39, %v2975_v26  ;;  %v2608_v26 = vld [vmem:[%s3663_s5 + $0x40] sm:$0xff] }
 0x26e   :  { %v1051_v8 = vadd.f32 %v1050_v3, %v962_v41  ;;  %v719_v18 = vmax.f32 %v652_v53, 0.0  ;;  %v2386_v3 = vld [vmem:[#allocation2 + $0x190] sm:$0xf]  ;;  %v2587_v41 = vld [vmem:[#allocation2 + $0x194] sm:$0xf0] }
 0x26f   :  { %3721 = vst [vmem:[#allocation30_spill] sm:$0xff] %v3062_v56 }
 0x270   :  { %v1052_v5 = vpop.f32.mrf.mxu0  ;;  %v1130_v17 = vmax.f32 %v1051_v8, 0.0 }
 0x271   :  { %1265 = vmatpush.bf16.msrb.mxu1 %v2609_v54  ;;  %v1053_v32 = vadd.f32 %v1052_v5, %v964_v42  ;;  %v2602_v42 = vld [vmem:[%s3663_s5 + $0x10] sm:$0xff] }
 0x273   :  { %v653_v50 = vpop.f32.mrf.mxu2  ;;  %v1131_v54 = vmax.f32 %v1053_v32, 0.0 }
 0x274   :  { %v654_v2 = vadd.f32 %v653_v50, %v565_v11  ;;  %v2603_v50 = vld [vmem:[%s3663_s5 + $0x18] sm:$0xff]  ;;  %v3074_v11 = vor.u32 %v2587_v41, %v2386_v3 }
 0x275   :  { %1400 = vmatpush.bf16.msrb.mxu2 %v2603_v50  ;;  %1266 = vmatpush.bf16.msrb.mxu1 %v2608_v26  ;;  %v1162_v8 = vpack.c.bf16 %v1131_v54, %v1130_v17  ;;  %v2586_v50 = vld [vmem:[#allocation2 + $0x194] sm:$0xf]  ;;  %v2388_v3 = vld [vmem:[#allocation2 + $0x198] sm:$0xf0]  ;;  %v2564_v26 = vld [vmem:[#allocation2 + $0xe4] sm:$0xf] }
 0x276   :  { %v720_v61 = vmax.f32 %v654_v2, 0.0  ;;  %1005 = vmatmul.bf16.gmra.mxu3 %v3074_v11  ;;  %v3082_v2 = vpop.f32.mrf.mxu1  ;;  %v3090_v41 = vor.u32 %v2586_v50, %v2388_v3 }
 0x278   :  { %695 = vmatmul.bf16.gmra.mxu2 %v3062_v56  ;;  %v3076_v53 = vpack.c.bf16 %v720_v61, %v719_v18  ;;  %v966_v18 = vpop.f32.mrf.mxu3  ;;  %1267 = vmatmul.bf16.vlgmr.msrb.gmra.mxu1 %v1162_v8  ;;  %v1055_v36 = vpop.f32.mrf.mxu0  ;;  %v2601_v61 = vld [vmem:[%s3663_s5 + $0x8] sm:$0xff]  ;;  %3722 = vst [vmem:[#allocation31_spill] sm:$0xff] %v3090_v41 }
 0x279   :  { %1401 = vmatpush.bf16.msrb.mxu2 %v2602_v42  ;;  %v967_v32 = vadd.f32 %v2924_v39, %v966_v18  ;;  %v2300_v56 = vld [vmem:[#allocation2 + $0xe8] sm:$0xf0] }
 0x27a   :  { %v3101_v8 = vor.u32 %v2564_v26, %v2300_v56 }
 0x27b   :  { %v656_v6 = vpop.f32.mrf.mxu2  ;;  %1094 = vmatmul.bf16.gmra.mxu0 %v3090_v41  ;;  %v1056_v50 = vadd.f32 %v1055_v36, %v967_v32 }
 0x27c   :  { %v657_v5 = vadd.f32 %v656_v6, %v568_v38  ;;  %v570_v38 = vadd.f32 %v2924_v39, %v2985_v60  ;;  %v2600_v6 = vld [vmem:[%s3663_s5] sm:$0xff]  ;;  %3723 = vst [vmem:[#allocation32_spill] sm:$0xff] %v3101_v8  ;;  %v573_v60 = vadd.f32 %v2924_v39, %v2997_v24 }
 0x27d   :  { %1402 = vmatpush.bf16.msrb.mxu2 %v2601_v61  ;;  %v1132_v49 = vmax.f32 %v1056_v50, 0.0 }
 0x27e   :  { %v3096_v54 = vpop.f32.mrf.mxu1  ;;  %v721_v3 = vmax.f32 %v657_v5, 0.0 }
 0x280   :  { %v968_v18 = vpop.f32.mrf.mxu3  ;;  %v1057_v1 = vpop.f32.mrf.mxu0 }
 0x281   :  { %1403 = vmatpush.bf16.msrb.mxu2 %v2600_v6  ;;  %v969_v41 = vadd.f32 %v2924_v39, %v968_v18  ;;  %v2396_v18 = vld [vmem:[#allocation2 + $0x1a8] sm:$0xf0] }
 0x283   :  { %v658_v17 = vpop.f32.mrf.mxu2  ;;  %v1058_v62 = vadd.f32 %v1057_v1, %v969_v41 }
 0x284   :  { %v659_v42 = vadd.f32 %v658_v17, %v570_v38  ;;  %v3107_v38 = vor.u32 %v2589_v48, %v2394_v43  ;;  %v2566_v43 = vld [vmem:[#allocation2 + $0xf4] sm:$0xf]  ;;  %v2308_v48 = vld [vmem:[#allocation2 + $0xf8] sm:$0xf0] }
 0x285   :  { %v1133_v36 = vmax.f32 %v1058_v62, 0.0  ;;  %v575_v62 = vadd.f32 %v2924_v39, %v3013_v51 }
 0x286   :  { %v722_v61 = vmax.f32 %v659_v42, 0.0  ;;  %1010 = vmatmul.bf16.gmra.mxu3 %v3107_v38  ;;  %v3112_v32 = vpop.f32.mrf.mxu1  ;;  %v2588_v42 = vld [vmem:[#allocation2 + $0x1a4] sm:$0xf] }
 0x287   :  { %v1163_v17 = vpack.c.bf16 %v1133_v36, %v1132_v49 }
 0x288   :  { %700 = vmatmul.bf16.gmra.mxu2 %v3101_v8  ;;  %v3109_v56 = vpack.c.bf16 %v722_v61, %v721_v3  ;;  %v971_v6 = vpop.f32.mrf.mxu3  ;;  %v1060_v24 = vpop.f32.mrf.mxu0  ;;  %v3114_v8 = vor.u32 %v2588_v42, %v2396_v18  ;;  %v3122_v3 = vor.u32 %v2566_v43, %v2308_v48  ;;  %v578_v42 = vadd.f32 %v2924_v39, %v3034_v63  ;;  %v2402_v18 = vld [vmem:[#allocation2 + $0x1b0] sm:$0xf] }
 0x289   :  { %1272 = vmatmul.bf16.gmra.mxu1 %v1163_v17  ;;  %v972_v1 = vadd.f32 %v2924_v39, %v971_v6 }
 0x28a   :  { %3724 = vst [vmem:[#allocation33_spill] sm:$0xff] %v3114_v8 }
 0x28b   :  { %v661_v5 = vpop.f32.mrf.mxu2  ;;  %1099 = vmatmul.bf16.gmra.mxu0 %v3114_v8  ;;  %3725 = vst [vmem:[#allocation34_spill] sm:$0xff] %v3122_v3  ;;  %v1061_v61 = vadd.f32 %v1060_v24, %v972_v1  ;;  %v2591_v8 = vld [vmem:[#allocation2 + $0x1b4] sm:$0xf0] }
 0x28c   :  { %v662_v26 = vadd.f32 %v661_v5, %v573_v60  ;;  %v3128_v55 = vor.u32 %v2591_v8, %v2402_v18 }
 0x28d   :  { %v1134_v51 = vmax.f32 %v1061_v61, 0.0 }
 0x28e   :  { %v3120_v50 = vpop.f32.mrf.mxu1  ;;  %v723_v36 = vmax.f32 %v662_v26, 0.0  ;;  %3726 = vst [vmem:[#allocation35_spill] sm:$0xff] %v3128_v55 }
 0x290   :  { %v973_v60 = vpop.f32.mrf.mxu3  ;;  %v1062_v6 = vpop.f32.mrf.mxu0 }
 0x291   :  { %v974_v17 = vadd.f32 %v2924_v39, %v973_v60  ;;  %v2404_v60 = vld [vmem:[#allocation2 + $0x1b8] sm:$0xf0] }
 0x293   :  { %v663_v41 = vpop.f32.mrf.mxu2  ;;  %v1063_v37 = vadd.f32 %v1062_v6, %v974_v17 }
 0x294   :  { %v664_v49 = vadd.f32 %v663_v41, %v575_v62 }
 0x295   :  { %v1135_v24 = vmax.f32 %v1063_v37, 0.0  ;;  %v580_v37 = vadd.f32 %v2924_v39, %v3057_v10 }
 0x296   :  { %v724_v5 = vmax.f32 %v664_v49, 0.0  ;;  %1015 = vmatmul.bf16.gmra.mxu3 %v3128_v55  ;;  %v3133_v1 = vpop.f32.mrf.mxu1  ;;  %v2590_v49 = vld [vmem:[#allocation2 + $0x1b4] sm:$0xf]  ;;  %v2412_v55 = vld [vmem:[#allocation2 + $0x1c8] sm:$0xf0] }
 0x297   :  { %v1164_v62 = vpack.c.bf16 %v1135_v24, %v1134_v51 }
 0x298   :  { %705 = vmatmul.bf16.gmra.mxu2 %v3122_v3  ;;  %v3130_v43 = vpack.c.bf16 %v724_v5, %v723_v36  ;;  %v976_v41 = vpop.f32.mrf.mxu3  ;;  %v1065_v63 = vpop.f32.mrf.mxu0  ;;  %v3135_v3 = vor.u32 %v2590_v49, %v2404_v60 }
 0x299   :  { %1277 = vmatmul.bf16.gmra.mxu1 %v1164_v62  ;;  %v977_v8 = vadd.f32 %v2924_v39, %v976_v41  ;;  %v2410_v62 = vld [vmem:[#allocation2 + $0x1c0] sm:$0xf]  ;;  %v2593_v41 = vld [vmem:[#allocation2 + $0x1c4] sm:$0xf0] }
 0x29a   :  { %3727 = vst [vmem:[#allocation36_spill] sm:$0xff] %v3135_v3  ;;  %v3147_v60 = vor.u32 %v2593_v41, %v2410_v62 }
 0x29b   :  { %v666_v26 = vpop.f32.mrf.mxu2  ;;  %1104 = vmatmul.bf16.gmra.mxu0 %v3135_v3  ;;  %v1066_v17 = vadd.f32 %v1065_v63, %v977_v8 }
 0x29c   :  { %v667_v48 = vadd.f32 %v666_v26, %v578_v42  ;;  %v583_v26 = vadd.f32 %v2924_v39, %v3082_v2  ;;  %3728 = vst [vmem:[#allocation37_spill] sm:$0xff] %v3147_v60 }
 0x29d   :  { %v1136_v49 = vmax.f32 %v1066_v17, 0.0 }
 0x29e   :  { %v3141_v36 = vpop.f32.mrf.mxu1  ;;  %v725_v42 = vmax.f32 %v667_v48, 0.0 }
 0x2a0   :  { %v978_v6 = vpop.f32.mrf.mxu3  ;;  %v1067_v24 = vpop.f32.mrf.mxu0 }
 0x2a1   :  { %v979_v51 = vadd.f32 %v2924_v39, %v978_v6  ;;  %v2592_v6 = vld [vmem:[#allocation2 + $0x1c4] sm:$0xf] }
 0x2a3   :  { %v668_v61 = vpop.f32.mrf.mxu2  ;;  %v1068_v10 = vadd.f32 %v1067_v24, %v979_v51 }
 0x2a4   :  { %v669_v5 = vadd.f32 %v668_v61, %v580_v37 }
 0x2a5   :  { %v1137_v63 = vmax.f32 %v1068_v10, 0.0 }
 0x2a6   :  { %v726_v18 = vmax.f32 %v669_v5, 0.0  ;;  %1020 = vmatmul.bf16.gmra.mxu3 %v3147_v60  ;;  %v3152_v8 = vpop.f32.mrf.mxu1  ;;  %v2420_v60 = vld [vmem:[#allocation2 + $0x1d8] sm:$0xf0] }
 0x2a7   :  { %v1165_v61 = vpack.c.bf16 %v1137_v63, %v1136_v49 }
 0x2a8   :  { %1404 = vmatmul.bf16.vlgmr.msrb.gmra.mxu2 %v2947_v27  ;;  %v3149_v3 = vpack.c.bf16 %v726_v18, %v725_v42  ;;  %v981_v5 = vpop.f32.mrf.mxu3  ;;  %v1070_v2 = vpop.f32.mrf.mxu0  ;;  %v3154_v27 = vor.u32 %v2592_v6, %v2412_v55  ;;  %v585_v42 = vadd.f32 %v2924_v39, %v3096_v54  ;;  %v588_v55 = vadd.f32 %v2924_v39, %v3112_v32 }
 0x2a9   :  { %1282 = vmatmul.bf16.gmra.mxu1 %v1165_v61  ;;  %v982_v17 = vadd.f32 %v2924_v39, %v981_v5  ;;  %v2595_v61 = vld [vmem:[#allocation2 + $0x1d4] sm:$0xf0] }
 0x2aa   :  { %3729 = vst [vmem:[#allocation38_spill] sm:$0xff] %v3154_v27 }
 0x2ab   :  { %v671_v48 = vpop.f32.mrf.mxu2  ;;  %1109 = vmatmul.bf16.gmra.mxu0 %v3154_v27 }
 0x2ac   :  { %v672_v37 = vadd.f32 %v671_v48, %v583_v26  ;;  %v1071_v26 = vadd.f32 %v1070_v2, %v982_v17  ;;  %v2418_v48 = vld [vmem:[#allocation2 + $0x1d0] sm:$0xf] }
 0x2ad   :  { %v3166_v6 = vor.u32 %v2595_v61, %v2418_v48 }
 0x2ae   :  { %v3160_v51 = vpop.f32.mrf.mxu1  ;;  %v727_v41 = vmax.f32 %v672_v37, 0.0  ;;  %v1138_v5 = vmax.f32 %v1071_v26, 0.0 }
 0x2af   :  { %3730 = vst [vmem:[#allocation39_spill] sm:$0xff] %v3166_v6 }
 0x2b0   :  { %v983_v62 = vpop.f32.mrf.mxu3  ;;  %v1072_v63 = vpop.f32.mrf.mxu0 }
 0x2b1   :  { %v984_v10 = vadd.f32 %v2924_v39, %v983_v62  ;;  %v2594_v62 = vld [vmem:[#allocation2 + $0x1d4] sm:$0xf] }
 0x2b3   :  { %v673_v18 = vpop.f32.mrf.mxu2  ;;  %v1073_v54 = vadd.f32 %v1072_v63, %v984_v10 }
 0x2b4   :  { %v674_v24 = vadd.f32 %v673_v18, %v585_v42 }
 0x2b5   :  { %v1139_v2 = vmax.f32 %v1073_v54, 0.0 }
 0x2b6   :  { %v728_v49 = vmax.f32 %v674_v24, 0.0  ;;  %1025 = vmatmul.bf16.gmra.mxu3 %v3166_v6  ;;  %v3171_v17 = vpop.f32.mrf.mxu1  ;;  %v2428_v6 = vld [vmem:[#allocation2 + $0x1e8] sm:$0xf0] }
 0x2b7   :  { %v1166_v18 = vpack.c.bf16 %v1139_v2, %v1138_v5 }
 0x2b8   :  { %1409 = vmatmul.bf16.gmra.mxu2 %v2972_v21  ;;  %v3168_v27 = vpack.c.bf16 %v728_v49, %v727_v41  ;;  %v986_v24 = vpop.f32.mrf.mxu3  ;;  %v1075_v32 = vpop.f32.mrf.mxu0  ;;  %v3173_v21 = vor.u32 %v2594_v62, %v2420_v60  ;;  %v590_v41 = vadd.f32 %v2924_v39, %v3120_v50  ;;  %v593_v60 = vadd.f32 %v2924_v39, %v3133_v1 }
 0x2b9   :  { %1287 = vmatmul.bf16.gmra.mxu1 %v1166_v18  ;;  %v987_v26 = vadd.f32 %v2924_v39, %v986_v24  ;;  %v2597_v18 = vld [vmem:[#allocation2 + $0x1e4] sm:$0xf0] }
 0x2ba   :  { %3731 = vst [vmem:[#allocation40_spill] sm:$0xff] %v3173_v21 }
 0x2bb   :  { %v676_v37 = vpop.f32.mrf.mxu2  ;;  %1114 = vmatmul.bf16.gmra.mxu0 %v3173_v21 }
 0x2bc   :  { %v677_v42 = vadd.f32 %v676_v37, %v588_v55  ;;  %v1076_v55 = vadd.f32 %v1075_v32, %v987_v26  ;;  %v2426_v37 = vld [vmem:[#allocation2 + $0x1e0] sm:$0xf] }
 0x2bd   :  { %v3185_v62 = vor.u32 %v2597_v18, %v2426_v37 }
 0x2be   :  { %v3179_v10 = vpop.f32.mrf.mxu1  ;;  %v729_v61 = vmax.f32 %v677_v42, 0.0  ;;  %v1140_v24 = vmax.f32 %v1076_v55, 0.0 }
 0x2bf   :  { %3732 = vst [vmem:[#allocation41_spill] sm:$0xff] %v3185_v62 }
 0x2c0   :  { %v988_v48 = vpop.f32.mrf.mxu3  ;;  %v1077_v2 = vpop.f32.mrf.mxu0 }
 0x2c1   :  { %v989_v54 = vadd.f32 %v2924_v39, %v988_v48  ;;  %v2596_v48 = vld [vmem:[#allocation2 + $0x1e4] sm:$0xf] }
 0x2c3   :  { %v678_v49 = vpop.f32.mrf.mxu2  ;;  %v1078_v50 = vadd.f32 %v1077_v2, %v989_v54 }
 0x2c4   :  { %v679_v63 = vadd.f32 %v678_v49, %v590_v41 }
 0x2c5   :  { %v1141_v32 = vmax.f32 %v1078_v50, 0.0 }
 0x2c6   :  { %v730_v5 = vmax.f32 %v679_v63, 0.0  ;;  %1030 = vmatmul.bf16.gmra.mxu3 %v3185_v62  ;;  %v3190_v26 = vpop.f32.mrf.mxu1  ;;  %v2436_v62 = vld [vmem:[#allocation2 + $0x1f8] sm:$0xf0] }
 0x2c7   :  { %v1167_v49 = vpack.c.bf16 %v1141_v32, %v1140_v24 }
 0x2c8   :  { %1414 = vmatmul.bf16.gmra.mxu2 %v2994_v44  ;;  %v3187_v21 = vpack.c.bf16 %v730_v5, %v729_v61  ;;  %v991_v63 = vpop.f32.mrf.mxu3  ;;  %v1080_v1 = vpop.f32.mrf.mxu0  ;;  %v3192_v44 = vor.u32 %v2596_v48, %v2428_v6  ;;  %v595_v61 = vadd.f32 %v2924_v39, %v3141_v36  ;;  %v598_v6 = vadd.f32 %v2924_v39, %v3152_v8 }
 0x2c9   :  { %1292 = vmatmul.bf16.gmra.mxu1 %v1167_v49  ;;  %v992_v55 = vadd.f32 %v2924_v39, %v991_v63  ;;  %v2599_v49 = vld [vmem:[#allocation2 + $0x1f4] sm:$0xf0] }
 0x2ca   :  { %3733 = vst [vmem:[#allocation42_spill] sm:$0xff] %v3192_v44 }
 0x2cb   :  { %v681_v42 = vpop.f32.mrf.mxu2  ;;  %1119 = vmatmul.bf16.gmra.mxu0 %v3192_v44 }
 0x2cc   :  { %v682_v41 = vadd.f32 %v681_v42, %v593_v60  ;;  %v1081_v60 = vadd.f32 %v1080_v1, %v992_v55  ;;  %v2434_v42 = vld [vmem:[#allocation2 + $0x1f0] sm:$0xf] }
 0x2cd   :  { %v3204_v48 = vor.u32 %v2599_v49, %v2434_v42 }
 0x2ce   :  { %v3198_v54 = vpop.f32.mrf.mxu1  ;;  %v731_v18 = vmax.f32 %v682_v41, 0.0  ;;  %v1142_v63 = vmax.f32 %v1081_v60, 0.0 }
 0x2cf   :  { %3734 = vst [vmem:[#allocation43_spill] sm:$0xff] %v3204_v48 }
 0x2d0   :  { %v993_v37 = vpop.f32.mrf.mxu3  ;;  %v1082_v32 = vpop.f32.mrf.mxu0 }
 0x2d1   :  { %v994_v50 = vadd.f32 %v2924_v39, %v993_v37  ;;  %v2598_v37 = vld [vmem:[#allocation2 + $0x1f4] sm:$0xf] }
 0x2d3   :  { %v683_v5 = vpop.f32.mrf.mxu2  ;;  %v1083_v36 = vadd.f32 %v1082_v32, %v994_v50 }
 0x2d4   :  { %v684_v2 = vadd.f32 %v683_v5, %v595_v61 }
 0x2d5   :  { %v1143_v1 = vmax.f32 %v1083_v36, 0.0 }
 0x2d6   :  { %v732_v24 = vmax.f32 %v684_v2, 0.0  ;;  %1035 = vmatmul.bf16.gmra.mxu3 %v3204_v48  ;;  %v3209_v55 = vpop.f32.mrf.mxu1 }
 0x2d7   :  { %v1168_v5 = vpack.c.bf16 %v1143_v1, %v1142_v63 }
 0x2d8   :  { %1419 = vmatmul.bf16.gmra.mxu2 %v3028_v15  ;;  %v3206_v44 = vpack.c.bf16 %v732_v24, %v731_v18  ;;  %v996_v2 = vpop.f32.mrf.mxu3  ;;  %v1085_v8 = vpop.f32.mrf.mxu0  ;;  %v3211_v15 = vor.u32 %v2598_v37, %v2436_v62  ;;  %v600_v18 = vadd.f32 %v2924_v39, %v3160_v51  ;;  %v603_v62 = vadd.f32 %v2924_v39, %v3171_v17 }
 0x2d9   :  { %1297 = vmatmul.bf16.gmra.mxu1 %v1168_v5  ;;  %v997_v60 = vadd.f32 %v2924_v39, %v996_v2  ;;  %v605_v17 = vadd.f32 %v2924_v39, %v3179_v10 }
 0x2da   :  { %3735 = vst [vmem:[#allocation44_spill] sm:$0xff] %v3211_v15 }
 0x2db   :  { %v686_v41 = vpop.f32.mrf.mxu2  ;;  %1124 = vmatmul.bf16.gmra.mxu0 %v3211_v15 }
 0x2dc   :  { %v687_v61 = vadd.f32 %v686_v41, %v598_v6  ;;  %v1086_v6 = vadd.f32 %v1085_v8, %v997_v60 }
 0x2de   :  { %v3217_v50 = vpop.f32.mrf.mxu1  ;;  %v733_v49 = vmax.f32 %v687_v61, 0.0  ;;  %v1144_v41 = vmax.f32 %v1086_v6, 0.0 }
 0x2e0   :  { %v998_v42 = vpop.f32.mrf.mxu3  ;;  %v1087_v1 = vpop.f32.mrf.mxu0 }
 0x2e1   :  { %v999_v36 = vadd.f32 %v2924_v39, %v998_v42 }
 0x2e3   :  { %v688_v24 = vpop.f32.mrf.mxu2  ;;  %v1088_v5 = vadd.f32 %v1087_v1, %v999_v36 }
 0x2e4   :  { %v689_v32 = vadd.f32 %v688_v24, %v600_v18 }
 0x2e5   :  { %v1145_v51 = vmax.f32 %v1088_v5, 0.0 }
 0x2e6   :  { %v734_v63 = vmax.f32 %v689_v32, 0.0  ;;  %v3225_v15 = vpop.f32.mrf.mxu1 }
 0x2e7   :  { %v1169_v60 = vpack.c.bf16 %v1145_v51, %v1144_v41  ;;  %v608_v41 = vadd.f32 %v2924_v39, %v3190_v26  ;;  %v610_v26 = vadd.f32 %v2924_v39, %v3198_v54 }
 0x2e8   :  { %1424 = vmatmul.bf16.gmra.mxu2 %v3076_v53  ;;  %v3223_v2 = vpack.c.bf16 %v734_v63, %v733_v49  ;;  %v1001_v61 = vpop.f32.mrf.mxu3  ;;  %v1090_v18 = vpop.f32.mrf.mxu0 }
 0x2e9   :  { %1302 = vmatmul.bf16.gmra.mxu1 %v1169_v60  ;;  %v1002_v24 = vadd.f32 %v2924_v39, %v1001_v61 }
 0x2eb   :  { %v691_v37 = vpop.f32.mrf.mxu2  ;;  %v1091_v42 = vadd.f32 %v1090_v18, %v1002_v24 }
 0x2ec   :  { %v692_v8 = vadd.f32 %v691_v37, %v603_v62 }
 0x2ed   :  { %v1146_v5 = vmax.f32 %v1091_v42, 0.0 }
 0x2ee   :  { %v3230_v53 = vpop.f32.mrf.mxu1  ;;  %v735_v63 = vmax.f32 %v692_v8, 0.0 }
 0x2f0   :  { %v1003_v49 = vpop.f32.mrf.mxu3  ;;  %v1092_v62 = vpop.f32.mrf.mxu0 }
 0x2f1   :  { %v1004_v1 = vadd.f32 %v2924_v39, %v1003_v49 }
 0x2f3   :  { %v693_v32 = vpop.f32.mrf.mxu2  ;;  %v1093_v51 = vadd.f32 %v1092_v62, %v1004_v1 }
 0x2f4   :  { %v694_v6 = vadd.f32 %v693_v32, %v605_v17 }
 0x2f5   :  { %v1147_v10 = vmax.f32 %v1093_v51, 0.0 }
 0x2f6   :  { %v736_v36 = vmax.f32 %v694_v6, 0.0  ;;  %v3238_v61 = vpop.f32.mrf.mxu1 }
 0x2f7   :  { %v1170_v24 = vpack.c.bf16 %v1147_v10, %v1146_v5  ;;  %v613_v5 = vadd.f32 %v2924_v39, %v3209_v55  ;;  %v615_v55 = vadd.f32 %v2924_v39, %v3217_v50 }
 0x2f8   :  { %1429 = vmatmul.bf16.gmra.mxu2 %v3109_v56  ;;  %v3236_v37 = vpack.c.bf16 %v736_v36, %v735_v63  ;;  %v1095_v17 = vpop.f32.mrf.mxu0 }
 0x2f9   :  { %v1006_v8 = vpop.f32.mrf.mxu3  ;;  %1307 = vmatmul.bf16.gmra.mxu1 %v1170_v24 }
 0x2fa   :  { %v1007_v32 = vadd.f32 %v2924_v39, %v1006_v8 }
 0x2fb   :  { %v696_v60 = vpop.f32.mrf.mxu2 }
 0x2fc   :  { %v697_v18 = vadd.f32 %v696_v60, %v608_v41  ;;  %v1096_v49 = vadd.f32 %v1095_v17, %v1007_v32 }
 0x2fe   :  { %v3243_v56 = vpop.f32.mrf.mxu1  ;;  %v737_v36 = vmax.f32 %v697_v18, 0.0  ;;  %v1148_v51 = vmax.f32 %v1096_v49, 0.0 }
 0x300   :  { %v1097_v41 = vpop.f32.mrf.mxu0 }
 0x301   :  { %v1008_v63 = vpop.f32.mrf.mxu3 }
 0x302   :  { %v1009_v62 = vadd.f32 %v2924_v39, %v1008_v63 }
 0x303   :  { %v698_v6 = vpop.f32.mrf.mxu2 }
 0x304   :  { %v699_v42 = vadd.f32 %v698_v6, %v610_v26  ;;  %v1098_v10 = vadd.f32 %v1097_v41, %v1009_v62 }
 0x306   :  { %v738_v1 = vmax.f32 %v699_v42, 0.0  ;;  %v1149_v54 = vmax.f32 %v1098_v10, 0.0  ;;  %v3251_v8 = vpop.f32.mrf.mxu1 }
 0x308   :  { %1434 = vmatmul.bf16.gmra.mxu2 %v3130_v43  ;;  %v3249_v60 = vpack.c.bf16 %v738_v1, %v737_v36  ;;  %v1171_v32 = vpack.c.bf16 %v1149_v54, %v1148_v51  ;;  %v1100_v26 = vpop.f32.mrf.mxu0  ;;  %v618_v51 = vadd.f32 %v2924_v39, %v3225_v15  ;;  %v620_v15 = vadd.f32 %v2924_v39, %v3230_v53 }
 0x309   :  { %v1011_v18 = vpop.f32.mrf.mxu3 }
 0x30a   :  { %1312 = vmatmul.bf16.gmra.mxu1 %v1171_v32  ;;  %v1012_v6 = vadd.f32 %v2924_v39, %v1011_v18 }
 0x30b   :  { %v701_v24 = vpop.f32.mrf.mxu2 }
 0x30c   :  { %v702_v17 = vadd.f32 %v701_v24, %v613_v5  ;;  %v1101_v63 = vadd.f32 %v1100_v26, %v1012_v6 }
 0x30e   :  { %v3256_v43 = vpop.f32.mrf.mxu1  ;;  %v739_v1 = vmax.f32 %v702_v17, 0.0  ;;  %v1150_v10 = vmax.f32 %v1101_v63, 0.0 }
 0x310   :  { %v1102_v5 = vpop.f32.mrf.mxu0 }
 0x311   :  { %v1013_v36 = vpop.f32.mrf.mxu3 }
 0x312   :  { %v1014_v41 = vadd.f32 %v2924_v39, %v1013_v36 }
 0x313   :  { %v703_v42 = vpop.f32.mrf.mxu2 }
 0x314   :  { %v704_v49 = vadd.f32 %v703_v42, %v615_v55  ;;  %v1103_v54 = vadd.f32 %v1102_v5, %v1014_v41 }
 0x316   :  { %v740_v62 = vmax.f32 %v704_v49, 0.0  ;;  %v1151_v50 = vmax.f32 %v1103_v54, 0.0  ;;  %v3264_v18 = vpop.f32.mrf.mxu1 }
 0x318   :  { %1439 = vmatmul.bf16.gmra.mxu2 %v3149_v3  ;;  %v3262_v24 = vpack.c.bf16 %v740_v62, %v739_v1  ;;  %v1172_v6 = vpack.c.bf16 %v1151_v50, %v1150_v10  ;;  %v1105_v55 = vpop.f32.mrf.mxu0 }
 0x319   :  { %v1016_v17 = vpop.f32.mrf.mxu3 }
 0x31a   :  { %1317 = vmatmul.bf16.gmra.mxu1 %v1172_v6  ;;  %v1017_v42 = vadd.f32 %v2924_v39, %v1016_v17 }
 0x31b   :  { %v706_v32 = vpop.f32.mrf.mxu2 }
 0x31c   :  { %v707_v26 = vadd.f32 %v706_v32, %v618_v51  ;;  %v1106_v36 = vadd.f32 %v1105_v55, %v1017_v42 }
 0x31e   :  { %v3269_v3 = vpop.f32.mrf.mxu1  ;;  %v741_v62 = vmax.f32 %v707_v26, 0.0  ;;  %v1152_v10 = vmax.f32 %v1106_v36, 0.0 }
 0x320   :  { %v1107_v51 = vpop.f32.mrf.mxu0 }
 0x321   :  { %v1018_v1 = vpop.f32.mrf.mxu3 }
 0x322   :  { %v1019_v5 = vadd.f32 %v2924_v39, %v1018_v1  ;;  %v3279_v39 = vld [vmem:[%s3662_s4] ss:$0 sm:$0xff] }
 0x323   :  { %v708_v49 = vpop.f32.mrf.mxu2 }
 0x324   :  { %v709_v63 = vadd.f32 %v708_v49, %v620_v15  ;;  %v1108_v54 = vadd.f32 %v1107_v51, %v1019_v5 }
 0x326   :  { %v742_v41 = vmax.f32 %v709_v63, 0.0  ;;  %v1153_v32 = vmax.f32 %v1108_v54, 0.0  ;;  %v1283_v53 = vpop.f32.mrf.mxu1 }
 0x328   :  { %1444 = vmatmul.bf16.gmra.mxu2 %v3168_v27  ;;  %v3273_v50 = vpack.c.bf16 %v742_v41, %v741_v62  ;;  %v1173_v48 = vpack.c.bf16 %v1153_v32, %v1152_v10  ;;  %v1110_v55 = vpop.f32.mrf.mxu0 }
 0x329   :  { %v1021_v15 = vpop.f32.mrf.mxu3 }
 0x32a   :  { %1322 = vmatmul.bf16.gmra.mxu1 %v1173_v48  ;;  %v1022_v27 = vadd.f32 %v3279_v39, %v1021_v15 }
 0x32b   :  { %v1405_v6 = vpop.f32.mrf.mxu2 }
 0x32c   :  { %v1406_v17 = vadd.f32 %v1405_v6, %v3238_v61  ;;  %v1111_v63 = vadd.f32 %v1110_v55, %v1022_v27 }
 0x32e   :  { %v1285_v42 = vpop.f32.mrf.mxu1  ;;  %v1154_v48 = vmax.f32 %v1111_v63, 0.0 }
 0x330   :  { %v1112_v61 = vpop.f32.mrf.mxu0 }
 0x331   :  { %v1023_v36 = vpop.f32.mrf.mxu3 }
 0x332   :  { %v1024_v1 = vadd.f32 %v3279_v39, %v1023_v36 }
 0x333   :  { %v1407_v26 = vpop.f32.mrf.mxu2 }
 0x334   :  { %v1408_v49 = vadd.f32 %v1407_v26, %v3243_v56  ;;  %v1113_v41 = vadd.f32 %v1112_v61, %v1024_v1 }
 0x336   :  { %v3284_v62 = vpack.c.bf16 %v1408_v49, %v1406_v17  ;;  %v1155_v5 = vmax.f32 %v1113_v41, 0.0  ;;  %v1288_v32 = vpop.f32.mrf.mxu1 }
 0x338   :  { %1449 = vmatmul.bf16.gmra.mxu2 %v3187_v21  ;;  %v1174_v54 = vpack.c.bf16 %v1155_v5, %v1154_v48  ;;  %v1115_v56 = vpop.f32.mrf.mxu0 }
 0x339   :  { %v1026_v6 = vpop.f32.mrf.mxu3 }
 0x33a   :  { %1327 = vmatmul.bf16.gmra.mxu1 %v1174_v54  ;;  %v1027_v15 = vadd.f32 %v3279_v39, %v1026_v6 }
 0x33b   :  { %v1410_v51 = vpop.f32.mrf.mxu2 }
 0x33c   :  { %v1411_v10 = vadd.f32 %v1410_v51, %v3251_v8  ;;  %v1116_v17 = vadd.f32 %v1115_v56, %v1027_v15 }
 0x33e   :  { %v3293_v36 = vpop.f32.mrf.mxu1  ;;  %v1156_v8 = vmax.f32 %v1116_v17, 0.0 }
 0x340   :  { %v1117_v49 = vpop.f32.mrf.mxu0 }
 0x341   :  { %v1028_v26 = vpop.f32.mrf.mxu3 }
 0x342   :  { %v1029_v21 = vadd.f32 %v3279_v39, %v1028_v26 }
 0x343   :  { %v1412_v55 = vpop.f32.mrf.mxu2 }
 0x344   :  { %v1413_v27 = vadd.f32 %v1412_v55, %v3256_v43  ;;  %v1118_v1 = vadd.f32 %v1117_v49, %v1029_v21 }
 0x346   :  { %v3291_v63 = vpack.c.bf16 %v1413_v27, %v1411_v10  ;;  %v1157_v61 = vmax.f32 %v1118_v1, 0.0  ;;  %v3298_v6 = vpop.f32.mrf.mxu1 }
 0x348   :  { %1454 = vmatmul.bf16.gmra.mxu2 %v3206_v44  ;;  %v1175_v5 = vpack.c.bf16 %v1157_v61, %v1156_v8  ;;  %v1120_v43 = vpop.f32.mrf.mxu0 }
 0x349   :  { %v1031_v51 = vpop.f32.mrf.mxu3 }
 0x34a   :  { %1332 = vmatmul.bf16.gmra.mxu1 %v1175_v5  ;;  %v1032_v54 = vadd.f32 %v3279_v39, %v1031_v51 }
 0x34b   :  { %v1415_v48 = vpop.f32.mrf.mxu2 }
 0x34c   :  { %v1416_v41 = vadd.f32 %v1415_v48, %v3264_v18  ;;  %v1121_v15 = vadd.f32 %v1120_v43, %v1032_v54 }
 0x34e   :  { %v1158_v18 = vmax.f32 %v1121_v15, 0.0  ;;  %v1295_v8 = vpop.f32.mrf.mxu1 }
 0x350   :  { %v1122_v27 = vpop.f32.mrf.mxu0 }
 0x351   :  { %v1033_v55 = vpop.f32.mrf.mxu3 }
 0x352   :  { %v1034_v44 = vadd.f32 %v3279_v39, %v1033_v55 }
 0x353   :  { %v1417_v10 = vpop.f32.mrf.mxu2 }
 0x354   :  { %v1418_v56 = vadd.f32 %v1417_v10, %v3269_v3  ;;  %v1123_v26 = vadd.f32 %v1122_v27, %v1034_v44 }
 0x356   :  { %v3302_v17 = vpack.c.bf16 %v1418_v56, %v1416_v41  ;;  %v1159_v21 = vmax.f32 %v1123_v26, 0.0  ;;  %v1298_v10 = vpop.f32.mrf.mxu1 }
 0x358   :  { %1459 = vmatmul.bf16.gmra.mxu2 %v3223_v2  ;;  %v1176_v61 = vpack.c.bf16 %v1159_v21, %v1158_v18  ;;  %v1125_v5 = vpop.f32.mrf.mxu0 }
 0x359   :  { %v1036_v48 = vpop.f32.mrf.mxu3 }
 0x35a   :  { %1337 = vmatmul.bf16.gmra.mxu1 %v1176_v61  ;;  %v1037_v3 = vadd.f32 %v3279_v39, %v1036_v48 }
 0x35b   :  { %v1420_v49 = vpop.f32.mrf.mxu2 }
 0x35c   :  { %v1421_v1 = vadd.f32 %v1420_v49, %v1283_v53  ;;  %v1126_v54 = vadd.f32 %v1125_v5, %v1037_v3 }
 0x35e   :  { %v1160_v55 = vmax.f32 %v1126_v54, 0.0  ;;  %v1300_v21 = vpop.f32.mrf.mxu1 }
 0x360   :  { %v1127_v2 = vpop.f32.mrf.mxu0 }
 0x361   :  { %v1038_v41 = vpop.f32.mrf.mxu3 }
 0x362   :  { %v1039_v56 = vadd.f32 %v3279_v39, %v1038_v41 }
 0x363   :  { %v1422_v51 = vpop.f32.mrf.mxu2 }
 0x364   :  { %v1423_v43 = vadd.f32 %v1422_v51, %v1285_v42  ;;  %v1128_v44 = vadd.f32 %v1127_v2, %v1039_v56 }
 0x366   :  { %v1488_v15 = vpack.c.bf16 %v1423_v43, %v1421_v1  ;;  %v1161_v53 = vmax.f32 %v1128_v44, 0.0  ;;  %v1303_v42 = vpop.f32.mrf.mxu1 }
 0x368   :  { %1464 = vmatmul.bf16.gmra.mxu2 %v3236_v37  ;;  %v1177_v26 = vpack.c.bf16 %v1161_v53, %v1160_v55 }
 0x36a   :  { %1342 = vmatmul.bf16.gmra.mxu1 %v1177_v26 }
 0x36b   :  { %v1425_v27 = vpop.f32.mrf.mxu2 }
 0x36c   :  { %v1426_v18 = vadd.f32 %v1425_v27, %v1288_v32 }
 0x36e   :  { %v1305_v5 = vpop.f32.mrf.mxu1 }
 0x373   :  { %v1427_v49 = vpop.f32.mrf.mxu2 }
 0x376   :  { %v1308_v1 = vpop.f32.mrf.mxu1 }
 0x378   :  { %1469 = vmatmul.bf16.gmra.mxu2 %v3249_v60 }
 0x37b   :  { %v1430_v61 = vpop.f32.mrf.mxu2 }
 0x37c   :  { %v1431_v27 = vadd.f32 %v1430_v61, %v3298_v6 }
 0x37e   :  { %v3310_v3 = vpop.f32.mrf.mxu1 }
 0x383   :  { %v1432_v48 = vpop.f32.mrf.mxu2 }
 0x384   :  { %v1433_v55 = vadd.f32 %v1432_v48, %v1295_v8 }
 0x387   :  { %v1313_v51 = vpop.f32.mrf.mxu1 }
 0x388   :  { %1474 = vmatmul.bf16.gmra.mxu2 %v3262_v24 }
 0x38b   :  { %v1435_v39 = vpop.f32.mrf.mxu2 }
 0x38c   :  { %v1436_v2 = vadd.f32 %v1435_v39, %v1298_v10 }
 0x38f   :  { %v3313_v53 = vpop.f32.mrf.mxu1 }
 0x393   :  { %v1437_v37 = vpop.f32.mrf.mxu2 }
 0x394   :  { %v1438_v56 = vadd.f32 %v1437_v37, %v1300_v21 }
 0x396   :  { %v1491_v44 = vpack.c.bf16 %v1438_v56, %v1436_v2 }
 0x397   :  { %v1318_v8 = vpop.f32.mrf.mxu1 }
 0x398   :  { %1479 = vmatmul.bf16.gmra.mxu2 %v3273_v50  ;;  %v1428_v50 = vadd.f32 %v1427_v49, %v3293_v36 }
 0x39a   :  { %v1489_v21 = vpack.c.bf16 %v1428_v50, %v1426_v18 }
 0x39b   :  { %v1440_v32 = vpop.f32.mrf.mxu2 }
 0x39c   :  { %v1441_v54 = vadd.f32 %v1440_v32, %v1303_v42  ;;  %v1490_v42 = vpack.c.bf16 %v1433_v55, %v1431_v27 }
 0x39f   :  { %v3325_v6 = vpop.f32.mrf.mxu1 }
 0x3a3   :  { %v1442_v43 = vpop.f32.mrf.mxu2 }
 0x3a4   :  { %v1443_v41 = vadd.f32 %v1442_v43, %v1305_v5 }
 0x3a6   :  { %v1492_v60 = vpack.c.bf16 %v1443_v41, %v1441_v54 }
 0x3a8   :  { %1505 = vmatpush.bf16.msrb.mxu3 %v1492_v60  ;;  %1715 = vmatpush.bf16.msra.mxu1 %v1492_v60 }
 0x3ab   :  { %v1445_v24 = vpop.f32.mrf.mxu2 }
 0x3ac   :  { %v3316_v26 = vadd.f32 %v1445_v24, %v1308_v1  ;;  %1506 = vmatpush.bf16.msrb.mxu3 %v1491_v44  ;;  %1716 = vmatpush.bf16.msra.mxu1 %v1491_v44 }
 0x3b0   :  { %1507 = vmatpush.bf16.msrb.mxu3 %v1490_v42  ;;  %1717 = vmatpush.bf16.msra.mxu1 %v1490_v42 }
 0x3b3   :  { %v3319_v10 = vpop.f32.mrf.mxu2 }
 0x3b4   :  { %1508 = vmatpush.bf16.msrb.mxu3 %v1489_v21  ;;  %1718 = vmatpush.bf16.msra.mxu1 %v1489_v21 }
 0x3b8   :  { %1509 = vmatpush.bf16.msrb.mxu3 %v1488_v15  ;;  %1719 = vmatpush.bf16.msra.mxu1 %v1488_v15  ;;  %v1323_v15 = vpop.f32.mrf.mxu1 }
 0x3bb   :  { %v1450_v48 = vpop.f32.mrf.mxu2 }
 0x3bc   :  { %v3321_v5 = vadd.f32 %v1450_v48, %v1313_v51  ;;  %1510 = vmatpush.bf16.msrb.mxu3 %v3302_v17  ;;  %1720 = vmatpush.bf16.msra.mxu1 %v3302_v17 }
 0x3c0   :  { %1511 = vmatpush.bf16.msrb.mxu3 %v3291_v63  ;;  %1721 = vmatpush.bf16.msra.mxu1 %v3291_v63  ;;  %v1325_v17 = vpop.f32.mrf.mxu1 }
 0x3c3   :  { %v3329_v36 = vpop.f32.mrf.mxu2 }
 0x3c4   :  { %1512 = vmatpush.bf16.msrb.mxu3 %v3284_v62  ;;  %1722 = vmatpush.bf16.msra.mxu1 %v3284_v62 }
 0x3c7   :  { %1513 = vmatmul.bf16.vlgmr.msrb.gmra.mxu3 %v2833_v58  ;;  %1723 = vmatmul.bf16.vlgmr.msra.gmra.mxu1 %v2870_v40 }
 0x3c8   :  { %v1328_v1 = vpop.f32.mrf.mxu1 }
 0x3cb   :  { %v1455_v18 = vpop.f32.mrf.mxu2 }
 0x3cc   :  { %v1456_v49 = vadd.f32 %v1455_v18, %v1318_v8 }
 0x3d0   :  { %v1330_v32 = vpop.f32.mrf.mxu1 }
 0x3d3   :  { %v1457_v61 = vpop.f32.mrf.mxu2 }
 0x3d7   :  { %1518 = vmatmul.bf16.gmra.mxu3 %v2836_v0  ;;  %1728 = vmatmul.bf16.gmra.mxu1 %v2882_v52 }
 0x3d8   :  { %v1333_v62 = vpop.f32.mrf.mxu1 }
 0x3db   :  { %v1460_v63 = vpop.f32.mrf.mxu2 }
 0x3dc   :  { %v1461_v39 = vadd.f32 %v1460_v63, %v1323_v15  ;;  %v1448_v15 = vadd.f32 %v3319_v10, %v3310_v3 }
 0x3e0   :  { %v1335_v0 = vpop.f32.mrf.mxu1 }
 0x3e3   :  { %v1462_v37 = vpop.f32.mrf.mxu2 }
 0x3e4   :  { %v1463_v42 = vadd.f32 %v1462_v37, %v1325_v17  ;;  %v3749_v17 = vld [vmem:[#allocation15_spill] sm:$0xff] }
 0x3e6   :  { %v1496_v8 = vpack.c.bf16 %v1463_v42, %v1461_v39 }
 0x3e7   :  { %1523 = vmatmul.bf16.gmra.mxu3 %v2839_v7  ;;  %1733 = vmatmul.bf16.gmra.mxu1 %v2894_v4 }
 0x3e8   :  { %v1338_v54 = vpop.f32.mrf.mxu1 }
 0x3eb   :  { %v1465_v58 = vpop.f32.mrf.mxu2 }
 0x3ec   :  { %v1466_v40 = vadd.f32 %v1465_v58, %v1328_v1 }
 0x3f0   :  { %v1340_v7 = vpop.f32.mrf.mxu1 }
 0x3f3   :  { %v1467_v51 = vpop.f32.mrf.mxu2 }
 0x3f7   :  { %1528 = vmatmul.bf16.gmra.mxu3 %v2846_v16  ;;  %1738 = vmatmul.bf16.gmra.mxu1 %v2908_v23 }
 0x3f8   :  { %v1343_v4 = vpop.f32.mrf.mxu1 }
 0x3fb   :  { %v1470_v43 = vpop.f32.mrf.mxu2 }
 0x400   :  { %v1345_v16 = vpop.f32.mrf.mxu1 }
 0x403   :  { %v1472_v52 = vpop.f32.mrf.mxu2 }
 0x407   :  { %1533 = vmatmul.bf16.gmra.mxu3 %v2852_v22  ;;  %1743 = vmatmul.bf16.gmra.mxu1 %v2930_v47  ;;  %v1473_v47 = vadd.f32 %v1472_v52, %v1335_v0  ;;  %v3752_v0 = vld [vmem:[#allocation18_spill] sm:$0xff] }
 0x40b   :  { %v1475_v41 = vpop.f32.mrf.mxu2 }
 0x40c   :  { %v1476_v22 = vadd.f32 %v1475_v41, %v1338_v54 }
 0x413   :  { %v1477_v56 = vpop.f32.mrf.mxu2 }
 0x414   :  { %v1478_v44 = vadd.f32 %v1477_v56, %v1340_v7 }
 0x416   :  { %v1499_v27 = vpack.c.bf16 %v1478_v44, %v1476_v22 }
 0x417   :  { %1538 = vmatmul.bf16.gmra.mxu3 %v2858_v28  ;;  %1748 = vmatmul.bf16.gmra.mxu1 %v2950_v30  ;;  %v1471_v28 = vadd.f32 %v1470_v43, %v1333_v62  ;;  %v1468_v30 = vadd.f32 %v1467_v51, %v1330_v32  ;;  %v3753_v43 = vld [vmem:[#allocation31_spill] sm:$0xff] }
 0x419   :  { %v1498_v50 = vpack.c.bf16 %v1473_v47, %v1471_v28  ;;  %v1497_v21 = vpack.c.bf16 %v1468_v30, %v1466_v40  ;;  %v3751_v40 = vld [vmem:[#allocation28_spill] sm:$0xff]  ;;  %v3755_v30 = vld [vmem:[#allocation21_spill] sm:$0xff] }
 0x41b   :  { %v1480_v60 = vpop.f32.mrf.mxu2 }
 0x41c   :  { %v1481_v23 = vadd.f32 %v1480_v60, %v1343_v4 }
 0x423   :  { %v1482_v2 = vpop.f32.mrf.mxu2 }
 0x424   :  { %v1483_v55 = vadd.f32 %v1482_v2, %v1345_v16  ;;  %v3754_v16 = vld [vmem:[#allocation37_spill] sm:$0xff] }
 0x426   :  { %v1500_v24 = vpack.c.bf16 %v1483_v55, %v1481_v23 }
 0x427   :  { %1543 = vmatmul.bf16.gmra.mxu3 %v2864_v34  ;;  %1753 = vmatmul.bf16.gmra.mxu1 %v2970_v20  ;;  %v1458_v34 = vadd.f32 %v1457_v61, %v3325_v6  ;;  %v1453_v20 = vadd.f32 %v3329_v36, %v3313_v53  ;;  %v1493_v6 = vpack.c.bf16 %v1448_v15, %v3316_v26  ;;  %v3385_v53 = vld [vmem:[%s3664_s6] ss:$0 sm:$0xff]  ;;  %v3750_v61 = vld [vmem:[#allocation29_spill] sm:$0xff] }
 0x428   :  { %1594 = vmatpush.bf16.msra.mxu0 %v1500_v24  ;;  %1804 = vmatpush.bf16.msra.mxu2 %v1500_v24 }
 0x429   :  { %v1495_v48 = vpack.c.bf16 %v1458_v34, %v1456_v49  ;;  %v1494_v18 = vpack.c.bf16 %v1453_v20, %v3321_v5  ;;  %v3748_v5 = vld [vmem:[#allocation25_spill] sm:$0xff] }
 0x42c   :  { %1595 = vmatpush.bf16.msra.mxu0 %v1499_v27  ;;  %1805 = vmatpush.bf16.msra.mxu2 %v1499_v27 }
 0x430   :  { %1596 = vmatpush.bf16.msra.mxu0 %v1498_v50  ;;  %1806 = vmatpush.bf16.msra.mxu2 %v1498_v50  ;;  %v3756_v50 = vld [vmem:[#allocation33_spill] sm:$0xff] }
 0x434   :  { %1597 = vmatpush.bf16.msra.mxu0 %v1497_v21  ;;  %1807 = vmatpush.bf16.msra.mxu2 %v1497_v21 }
 0x437   :  { %1548 = vmatmul.bf16.gmra.mxu3 %v2873_v45  ;;  %1758 = vmatmul.bf16.gmra.mxu1 %v2992_v35  ;;  %v3738_v45 = vld [vmem:[#allocation11_spill] sm:$0xff] }
 0x438   :  { %1598 = vmatpush.bf16.msra.mxu0 %v1496_v8  ;;  %1808 = vmatpush.bf16.msra.mxu2 %v1496_v8 }
 0x43c   :  { %1599 = vmatpush.bf16.msra.mxu0 %v1495_v48  ;;  %1809 = vmatpush.bf16.msra.mxu2 %v1495_v48 }
 0x440   :  { %1600 = vmatpush.bf16.msra.mxu0 %v1494_v18  ;;  %1810 = vmatpush.bf16.msra.mxu2 %v1494_v18  ;;  %v3757_v18 = vld [vmem:[#allocation39_spill] sm:$0xff] }
 0x444   :  { %1601 = vmatpush.bf16.msra.mxu0 %v1493_v6  ;;  %1811 = vmatpush.bf16.msra.mxu2 %v1493_v6  ;;  %v1724_v52 = vpop.f32.mrf.mxu1 }
 0x445   :  { %v1725_v23 = vadd.f32 %v3385_v53, %v1724_v52  ;;  %v3763_v52 = vld [vmem:[#allocation43_spill] sm:$0xff] }
 0x447   :  { %1602 = vmatmul.bf16.vlgmr.msra.gmra.mxu0 %v2843_v13  ;;  %1812 = vmatmul.bf16.vlgmr.msra.gmra.mxu2 %v2875_v46  ;;  %v3736_v13 = vld [vmem:[#allocation16_spill] sm:$0xff]  ;;  %v3739_v46 = vld [vmem:[#allocation17_spill] sm:$0xff] }
 0x448   :  { %1553 = vmatmul.bf16.gmra.mxu3 %v2885_v57  ;;  %1763 = vmatmul.bf16.gmra.mxu1 %v3026_v14  ;;  %v3740_v57 = vld [vmem:[#allocation12_spill] sm:$0xff]  ;;  %v3745_v14 = vld [vmem:[#allocation22_spill] sm:$0xff] }
 0x44c   :  { %v1726_v60 = vpop.f32.mrf.mxu1 }
 0x44d   :  { %v1727_v55 = vadd.f32 %v3385_v53, %v1726_v60 }
 0x454   :  { %v1729_v42 = vpop.f32.mrf.mxu1 }
 0x457   :  { %1607 = vmatmul.bf16.gmra.mxu0 %v2849_v19  ;;  %1817 = vmatmul.bf16.gmra.mxu2 %v2887_v59  ;;  %v3737_v19 = vld [vmem:[#allocation35_spill] sm:$0xff]  ;;  %v1514_v59 = vpop.f32.mrf.mxu3 }
 0x458   :  { %1558 = vmatmul.bf16.gmra.mxu3 %v2897_v9  ;;  %1768 = vmatmul.bf16.gmra.mxu1 %v3074_v11  ;;  %v3746_v11 = vld [vmem:[#allocation14_spill] sm:$0xff]  ;;  %v1515_v26 = vadd.f32 %v3385_v53, %v1514_v59 }
 0x45c   :  { %v1731_v15 = vpop.f32.mrf.mxu1 }
 0x45f   :  { %v1516_v9 = vpop.f32.mrf.mxu3 }
 0x460   :  { %v1517_v39 = vadd.f32 %v3385_v53, %v1516_v9 }
 0x467   :  { %1612 = vmatmul.bf16.gmra.mxu0 %v2855_v25  ;;  %1822 = vmatmul.bf16.gmra.mxu2 %v2900_v12  ;;  %v3741_v25 = vld [vmem:[#allocation20_spill] sm:$0xff]  ;;  %v3742_v12 = vld [vmem:[#allocation19_spill] sm:$0xff] }
 0x468   :  { %1563 = vmatmul.bf16.gmra.mxu3 %v2913_v29  ;;  %1773 = vmatmul.bf16.gmra.mxu1 %v3107_v38  ;;  %v3743_v29 = vld [vmem:[#allocation13_spill] sm:$0xff]  ;;  %v3747_v38 = vld [vmem:[#allocation26_spill] sm:$0xff] }
 0x477   :  { %1617 = vmatmul.bf16.gmra.mxu0 %v2861_v31  ;;  %1827 = vmatmul.bf16.gmra.mxu2 %v2916_v33  ;;  %v3744_v31 = vld [vmem:[#allocation23_spill] sm:$0xff]  ;;  %v1519_v33 = vpop.f32.mrf.mxu3 }
 0x478   :  { %1568 = vmatmul.bf16.gmra.mxu3 %v3736_v13  ;;  %1778 = vmatmul.bf16.gmra.mxu1 %v3737_v19  ;;  %v1520_v32 = vadd.f32 %v3385_v53, %v1519_v33  ;;  %v1730_v13 = vadd.f32 %v3385_v53, %v1729_v42  ;;  %v1732_v19 = vadd.f32 %v3385_v53, %v1731_v15 }
 0x47f   :  { %v1521_v35 = vpop.f32.mrf.mxu3 }
 0x480   :  { %v1522_v7 = vadd.f32 %v3385_v53, %v1521_v35 }
 0x487   :  { %1622 = vmatmul.bf16.gmra.mxu0 %v3738_v45  ;;  %1832 = vmatmul.bf16.gmra.mxu2 %v3739_v46  ;;  %v1524_v3 = vpop.f32.mrf.mxu3 }
 0x488   :  { %1573 = vmatmul.bf16.gmra.mxu3 %v3742_v12  ;;  %1783 = vmatmul.bf16.gmra.mxu1 %v3754_v16  ;;  %v1525_v2 = vadd.f32 %v3385_v53, %v1524_v3  ;;  %v3758_v12 = vld [vmem:[#allocation24_spill] sm:$0xff] }
 0x48f   :  { %v1526_v10 = vpop.f32.mrf.mxu3 }
 0x490   :  { %v1527_v8 = vadd.f32 %v3385_v53, %v1526_v10 }
 0x497   :  { %1627 = vmatmul.bf16.gmra.mxu0 %v3740_v57  ;;  %1837 = vmatmul.bf16.gmra.mxu2 %v3741_v25  ;;  %v1529_v63 = vpop.f32.mrf.mxu3 }
 0x498   :  { %1578 = vmatmul.bf16.gmra.mxu3 %v3745_v14  ;;  %1788 = vmatmul.bf16.gmra.mxu1 %v3757_v18  ;;  %v1530_v6 = vadd.f32 %v3385_v53, %v1529_v63 }
 0x49f   :  { %v1531_v58 = vpop.f32.mrf.mxu3 }
 0x4a0   :  { %v1532_v14 = vadd.f32 %v3385_v53, %v1531_v58 }
 0x4a7   :  { %1632 = vmatmul.bf16.gmra.mxu0 %v3743_v29  ;;  %1842 = vmatmul.bf16.gmra.mxu2 %v3744_v31  ;;  %v3402_v54 = vpop.f32.mrf.mxu3  ;;  %v3759_v29 = vld [vmem:[#allocation36_spill] sm:$0xff]  ;;  %v1734_v31 = vpop.f32.mrf.mxu1 }
 0x4a8   :  { %1583 = vmatmul.bf16.gmra.mxu3 %v3748_v5  ;;  %v1735_v10 = vadd.f32 %v3385_v53, %v1734_v31 }
 0x4af   :  { %v3411_v44 = vpop.f32.mrf.mxu3  ;;  %v1736_v3 = vpop.f32.mrf.mxu1 }
 0x4b0   :  { %v1737_v5 = vadd.f32 %v3385_v53, %v1736_v3 }
 0x4b7   :  { %1637 = vmatmul.bf16.gmra.mxu0 %v3746_v11  ;;  %1847 = vmatmul.bf16.gmra.mxu2 %v3747_v38  ;;  %v3421_v21 = vpop.f32.mrf.mxu3  ;;  %v1739_v58 = vpop.f32.mrf.mxu1 }
 0x4b8   :  { %1588 = vmatmul.bf16.gmra.mxu3 %v3751_v40 }
 0x4bf   :  { %v3430_v45 = vpop.f32.mrf.mxu3 }
 0x4c4   :  { %v1603_v36 = vpop.f32.mrf.mxu0 }
 0x4c5   :  { %v3389_v49 = vadd.f32 %v1603_v36, %v1515_v26  ;;  %v3760_v26 = vld [vmem:[#allocation41_spill] sm:$0xff] }
 0x4c6   :  { %1793 = vmatmul.bf16.gmra.mxu1 %v3760_v26 }
 0x4c7   :  { %1642 = vmatmul.bf16.gmra.mxu0 %v3749_v17  ;;  %1852 = vmatmul.bf16.gmra.mxu2 %v3750_v61  ;;  %v3440_v33 = vpop.f32.mrf.mxu3 }
 0x4ca   :  { %v1813_v41 = vpop.f32.mrf.mxu2 }
 0x4cb   :  { %v3413_v22 = vadd.f32 %v1813_v41, %v1725_v23  ;;  %v1740_v41 = vadd.f32 %v3385_v53, %v1739_v58  ;;  %v3764_v23 = vld [vmem:[#allocation30_spill] sm:$0xff] }
 0x4cc   :  { %v1605_v1 = vpop.f32.mrf.mxu0 }
 0x4cd   :  { %v3394_v37 = vadd.f32 %v1605_v1, %v1517_v39  ;;  %v3761_v1 = vld [vmem:[#allocation27_spill] sm:$0xff] }
 0x4cf   :  { %v1546_v39 = vpop.f32.mrf.mxu3 }
 0x4d2   :  { %v1815_v24 = vpop.f32.mrf.mxu2 }
 0x4d3   :  { %v3415_v47 = vadd.f32 %v1815_v24, %v1727_v55  ;;  %v3765_v55 = vld [vmem:[#allocation40_spill] sm:$0xff] }
 0x4d4   :  { %v1608_v62 = vpop.f32.mrf.mxu0 }
 0x4d5   :  { %v3398_v51 = vadd.f32 %v1608_v62, %v1520_v32  ;;  %v3762_v32 = vld [vmem:[#allocation38_spill] sm:$0xff] }
 0x4d7   :  { %1647 = vmatmul.bf16.gmra.mxu0 %v3752_v0  ;;  %1857 = vmatmul.bf16.gmra.mxu2 %v3753_v43  ;;  %v1549_v0 = vpop.f32.mrf.mxu3  ;;  %v1741_v43 = vpop.f32.mrf.mxu1 }
 0x4d8   :  { %1798 = vmatmul.bf16.gmra.mxu1 %v3763_v52 }
 0x4da   :  { %v1818_v34 = vpop.f32.mrf.mxu2 }
 0x4db   :  { %v3432_v57 = vadd.f32 %v1818_v34, %v1730_v13 }
 0x4dc   :  { %v1610_v56 = vpop.f32.mrf.mxu0 }
 0x4dd   :  { %v3405_v4 = vadd.f32 %v1610_v56, %v1522_v7  ;;  %v1742_v7 = vadd.f32 %v3385_v53, %v1741_v43 }
 0x4df   :  { %v1551_v24 = vpop.f32.mrf.mxu3 }
 0x4e0   :  { %v1552_v52 = vadd.f32 %v3385_v53, %v1551_v24 }
 0x4e2   :  { %v1820_v46 = vpop.f32.mrf.mxu2 }
 0x4e3   :  { %v3434_v25 = vadd.f32 %v1820_v46, %v1732_v19  ;;  %v3766_v19 = vld [vmem:[#allocation32_spill] sm:$0xff]  ;;  %v3767_v46 = vld [vmem:[#allocation42_spill] sm:$0xff] }
 0x4e4   :  { %v1613_v27 = vpop.f32.mrf.mxu0 }
 0x4e5   :  { %v3417_v28 = vadd.f32 %v1613_v27, %v1525_v2  ;;  %v1744_v27 = vpop.f32.mrf.mxu1 }
 0x4e6   :  { %v1745_v34 = vadd.f32 %v3385_v53, %v1744_v27 }
 0x4e7   :  { %1652 = vmatmul.bf16.gmra.mxu0 %v3755_v30  ;;  %1862 = vmatmul.bf16.gmra.mxu2 %v3756_v50 }
 0x4ea   :  { %v1823_v35 = vpop.f32.mrf.mxu2 }
 0x4eb   :  { %v3448_v17 = vadd.f32 %v1823_v35, %v1735_v10 }
 0x4ec   :  { %v1615_v20 = vpop.f32.mrf.mxu0 }
 0x4ed   :  { %v3424_v48 = vadd.f32 %v1615_v20, %v1527_v8  ;;  %v1746_v42 = vpop.f32.mrf.mxu1  ;;  %v1554_v20 = vpop.f32.mrf.mxu3 }
 0x4ee   :  { %v1747_v8 = vadd.f32 %v3385_v53, %v1746_v42  ;;  %v1540_v42 = vadd.f32 %v3385_v53, %v3421_v21 }
 0x4f2   :  { %v1825_v36 = vpop.f32.mrf.mxu2 }
 0x4f3   :  { %v3450_v61 = vadd.f32 %v1825_v36, %v1737_v5 }
 0x4f4   :  { %v1618_v59 = vpop.f32.mrf.mxu0 }
 0x4f5   :  { %v3436_v9 = vadd.f32 %v1618_v59, %v1530_v6  ;;  %v1749_v59 = vpop.f32.mrf.mxu1  ;;  %v1556_v31 = vpop.f32.mrf.mxu3 }
 0x4f7   :  { %1657 = vmatmul.bf16.gmra.mxu0 %v3758_v12  ;;  %1867 = vmatmul.bf16.gmra.mxu2 %v3759_v29 }
 0x4fa   :  { %v1828_v40 = vpop.f32.mrf.mxu2 }
 0x4fb   :  { %v3461_v60 = vadd.f32 %v1828_v40, %v1740_v41  ;;  %v1550_v40 = vadd.f32 %v3385_v53, %v1549_v0  ;;  %v1555_v0 = vadd.f32 %v3385_v53, %v1554_v20 }
 0x4fc   :  { %v1620_v11 = vpop.f32.mrf.mxu0 }
 0x4fd   :  { %v3443_v38 = vadd.f32 %v1620_v11, %v1532_v14  ;;  %v1751_v35 = vpop.f32.mrf.mxu1  ;;  %v1750_v14 = vadd.f32 %v3385_v53, %v1749_v59  ;;  %v1559_v36 = vpop.f32.mrf.mxu3 }
 0x4fe   :  { %v1752_v11 = vadd.f32 %v3385_v53, %v1751_v35 }
 0x502   :  { %v1830_v56 = vpop.f32.mrf.mxu2 }
 0x503   :  { %v3463_v16 = vadd.f32 %v1830_v56, %v1742_v7  ;;  %v1545_v7 = vadd.f32 %v3385_v53, %v3440_v33  ;;  %v1547_v56 = vadd.f32 %v3385_v53, %v1546_v39 }
 0x504   :  { %v3452_v63 = vpop.f32.mrf.mxu0 }
 0x505   :  { %v1754_v58 = vpop.f32.mrf.mxu1 }
 0x506   :  { %v1755_v33 = vadd.f32 %v3385_v53, %v1754_v58 }
 0x507   :  { %1662 = vmatmul.bf16.gmra.mxu0 %v3761_v1  ;;  %1872 = vmatmul.bf16.gmra.mxu2 %v3762_v32  ;;  %v3768_v1 = vld [vmem:[#allocation34_spill] sm:$0xff]  ;;  %v3769_v32 = vld [vmem:[#allocation44_spill] sm:$0xff] }
 0x50a   :  { %v1833_v30 = vpop.f32.mrf.mxu2 }
 0x50b   :  { %v3469_v18 = vadd.f32 %v1833_v30, %v1745_v34  ;;  %v1542_v34 = vadd.f32 %v3385_v53, %v3430_v45  ;;  %v1535_v45 = vadd.f32 %v3385_v53, %v3402_v54 }
 0x50c   :  { %v3456_v62 = vpop.f32.mrf.mxu0 }
 0x50d   :  { %v1756_v24 = vpop.f32.mrf.mxu1 }
 0x50e   :  { %v1757_v39 = vadd.f32 %v3385_v53, %v1756_v24  ;;  %v1685_v24 = vmax.f32 %v3398_v51, 0.0 }
 0x512   :  { %v1835_v15 = vpop.f32.mrf.mxu2 }
 0x513   :  { %v3471_v6 = vadd.f32 %v1835_v15, %v1747_v8  ;;  %v1561_v8 = vpop.f32.mrf.mxu3 }
 0x514   :  { %v1628_v2 = vpop.f32.mrf.mxu0 }
 0x515   :  { %v1629_v35 = vadd.f32 %v1628_v2, %v1540_v42 }
 0x517   :  { %1667 = vmatmul.bf16.gmra.mxu0 %v3764_v23  ;;  %1877 = vmatmul.bf16.gmra.mxu2 %v3765_v55 }
 0x51a   :  { %v1838_v12 = vpop.f32.mrf.mxu2 }
 0x51b   :  { %v3477_v26 = vadd.f32 %v1838_v12, %v1750_v14  ;;  %v1564_v58 = vpop.f32.mrf.mxu3 }
 0x51c   :  { %v1630_v50 = vpop.f32.mrf.mxu0 }
 0x51d   :  { %v1631_v59 = vadd.f32 %v1630_v50, %v1542_v34  ;;  %v1687_v34 = vmax.f32 %v3417_v28, 0.0 }
 0x522   :  { %v1840_v3 = vpop.f32.mrf.mxu2 }
 0x523   :  { %v3479_v10 = vadd.f32 %v1840_v3, %v1752_v11  ;;  %v1694_v3 = vmax.f32 %v1631_v59, 0.0  ;;  %v1566_v42 = vpop.f32.mrf.mxu3  ;;  %v1565_v59 = vadd.f32 %v3385_v53, %v1564_v58 }
 0x524   :  { %v1633_v13 = vpop.f32.mrf.mxu0 }
 0x525   :  { %v1634_v15 = vadd.f32 %v1633_v13, %v1545_v7  ;;  %v1537_v13 = vadd.f32 %v3385_v53, %v3411_v44  ;;  %v1689_v7 = vmax.f32 %v3436_v9, 0.0 }
 0x527   :  { %1672 = vmatmul.bf16.gmra.mxu0 %v3766_v19  ;;  %1882 = vmatmul.bf16.gmra.mxu2 %v3767_v46  ;;  %v1695_v14 = vmax.f32 %v1634_v15, 0.0  ;;  %v1626_v50 = vadd.f32 %v3456_v62, %v1537_v13  ;;  %v1690_v62 = vmax.f32 %v3443_v38, 0.0  ;;  %v1684_v15 = vmax.f32 %v3394_v37, 0.0 }
 0x52a   :  { %v1843_v43 = vpop.f32.mrf.mxu2 }
 0x52c   :  { %v1635_v29 = vpop.f32.mrf.mxu0 }
 0x52d   :  { %v1636_v27 = vadd.f32 %v1635_v29, %v1547_v56  ;;  %v3495_v29 = vadd.f32 %v1843_v43, %v1755_v33  ;;  %v1557_v43 = vadd.f32 %v3385_v53, %v1556_v31 }
 0x52f   :  { %v1696_v12 = vmax.f32 %v1636_v27, 0.0 }
 0x532   :  { %v1845_v46 = vpop.f32.mrf.mxu2 }
 0x533   :  { %v3497_v21 = vadd.f32 %v1845_v46, %v1757_v39  ;;  %v1683_v39 = vmax.f32 %v3389_v49, 0.0  ;;  %v1569_v46 = vpop.f32.mrf.mxu3 }
 0x534   :  { %v1638_v5 = vpop.f32.mrf.mxu0 }
 0x535   :  { %v1639_v23 = vadd.f32 %v1638_v5, %v1550_v40  ;;  %v1759_v5 = vpop.f32.mrf.mxu1  ;;  %v1692_v40 = vmax.f32 %v1626_v50, 0.0  ;;  %v1567_v50 = vadd.f32 %v3385_v53, %v1566_v42 }
 0x536   :  { %v1760_v56 = vadd.f32 %v3385_v53, %v1759_v5 }
 0x537   :  { %1677 = vmatmul.bf16.gmra.mxu0 %v3768_v1  ;;  %1887 = vmatmul.bf16.gmra.mxu2 %v3769_v32  ;;  %v1697_v19 = vmax.f32 %v1639_v23, 0.0  ;;  %v1624_v1 = vadd.f32 %v3452_v63, %v1535_v45  ;;  %v1693_v32 = vmax.f32 %v1629_v35, 0.0  ;;  %v1560_v63 = vadd.f32 %v3385_v53, %v1559_v36 }
 0x538   :  { %v1686_v36 = vmax.f32 %v3405_v4, 0.0 }
 0x539   :  { %v1691_v2 = vmax.f32 %v1624_v1, 0.0 }
 0x53a   :  { %v1848_v54 = vpop.f32.mrf.mxu2 }
 0x53b   :  { %v3516_v27 = vadd.f32 %v1848_v54, %v1760_v56  ;;  %v1571_v49 = vpop.f32.mrf.mxu3 }
 0x53c   :  { %v1640_v41 = vpop.f32.mrf.mxu0  ;;  %v1572_v56 = vadd.f32 %v3385_v53, %v1571_v49 }
 0x53d   :  { %v1641_v55 = vadd.f32 %v1640_v41, %v1552_v52  ;;  %v1761_v41 = vpop.f32.mrf.mxu1 }
 0x53e   :  { %v1762_v23 = vadd.f32 %v3385_v53, %v1761_v41 }
 0x53f   :  { %v1698_v30 = vmax.f32 %v1641_v55, 0.0  ;;  %v1688_v55 = vmax.f32 %v3424_v48, 0.0 }
 0x541   :  { %1927 = vmatpush.msra.mxu3 %v1698_v30 }
 0x542   :  { %v1850_v31 = vpop.f32.mrf.mxu2 }
 0x543   :  { %1928 = vmatpush.msra.mxu3 %v1697_v19  ;;  %v3518_v30 = vadd.f32 %v1850_v31, %v1762_v23  ;;  %v1562_v19 = vadd.f32 %v3385_v53, %v1561_v8 }
 0x544   :  { %v1643_v20 = vpop.f32.mrf.mxu0 }
 0x545   :  { %v3503_v11 = vadd.f32 %v1643_v20, %v1555_v0  ;;  %1929 = vmatpush.msra.mxu3 %v1696_v12  ;;  %v1764_v0 = vpop.f32.mrf.mxu1 }
 0x546   :  { %v1765_v51 = vadd.f32 %v3385_v53, %v1764_v0 }
 0x547   :  { %1930 = vmatpush.msra.mxu3 %v1695_v14 }
 0x549   :  { %1931 = vmatpush.msra.mxu3 %v1694_v3 }
 0x54a   :  { %v1853_v48 = vpop.f32.mrf.mxu2 }
 0x54b   :  { %1932 = vmatpush.msra.mxu3 %v1693_v32  ;;  %v3533_v37 = vadd.f32 %v1853_v48, %v1765_v51  ;;  %v1570_v32 = vadd.f32 %v3385_v53, %v1569_v46 }
 0x54c   :  { %v1645_v44 = vpop.f32.mrf.mxu0 }
 0x54d   :  { %v3508_v52 = vadd.f32 %v1645_v44, %v1557_v43  ;;  %1933 = vmatpush.msra.mxu3 %v1692_v40  ;;  %v1766_v4 = vpop.f32.mrf.mxu1  ;;  %3770 = vst [vmem:[#allocation16_spill] sm:$0xff] %v3533_v37  ;;  %v1574_v40 = vpop.f32.mrf.mxu3 }
 0x54e   :  { %v1767_v12 = vadd.f32 %v3385_v53, %v1766_v4  ;;  %v1575_v42 = vadd.f32 %v3385_v53, %v1574_v40 }
 0x54f   :  { %1934 = vmatpush.msra.mxu3 %v1691_v2 }
 0x551   :  { %1935 = vmatpush.msra.mxu3 %v1690_v62 }
 0x552   :  { %v1855_v45 = vpop.f32.mrf.mxu2 }
 0x553   :  { %1936 = vmatpush.msra.mxu3 %v1689_v7  ;;  %v3535_v8 = vadd.f32 %v1855_v45, %v1767_v12 }
 0x554   :  { %v1648_v38 = vpop.f32.mrf.mxu0 }
 0x555   :  { %v3521_v9 = vadd.f32 %v1648_v38, %v1560_v63  ;;  %1937 = vmatpush.msra.mxu3 %v1688_v55  ;;  %3771 = vst [vmem:[#allocation35_spill] sm:$0xff] %v3535_v8  ;;  %v1769_v35 = vpop.f32.mrf.mxu1  ;;  %v1576_v31 = vpop.f32.mrf.mxu3 }
 0x556   :  { %v1770_v58 = vadd.f32 %v3385_v53, %v1769_v35 }
 0x557   :  { %1938 = vmatpush.msra.mxu3 %v1687_v34 }
 0x559   :  { %1939 = vmatpush.msra.mxu3 %v1686_v36 }
 0x55a   :  { %v1858_v14 = vpop.f32.mrf.mxu2 }
 0x55b   :  { %1940 = vmatpush.msra.mxu3 %v1685_v24  ;;  %v3545_v44 = vadd.f32 %v1858_v14, %v1770_v58 }
 0x55c   :  { %v1650_v33 = vpop.f32.mrf.mxu0 }
 0x55d   :  { %v3528_v28 = vadd.f32 %v1650_v33, %v1562_v19  ;;  %1941 = vmatpush.msra.mxu3 %v1684_v15  ;;  %v1771_v1 = vpop.f32.mrf.mxu1  ;;  %v1579_v33 = vpop.f32.mrf.mxu3 }
 0x55e   :  { %v1772_v54 = vadd.f32 %v3385_v53, %v1771_v1 }
 0x55f   :  { %1942 = vmatpush.msra.mxu3 %v1683_v39 }
 0x562   :  { %v1860_v43 = vpop.f32.mrf.mxu2 }
 0x563   :  { %v3547_v2 = vadd.f32 %v1860_v43, %v1772_v54 }
 0x564   :  { %v1653_v20 = vpop.f32.mrf.mxu0 }
 0x565   :  { %v3537_v13 = vadd.f32 %v1653_v20, %v1565_v59  ;;  %v1774_v7 = vpop.f32.mrf.mxu1  ;;  %v1581_v59 = vpop.f32.mrf.mxu3 }
 0x566   :  { %v1775_v34 = vadd.f32 %v3385_v53, %v1774_v7 }
 0x56a   :  { %v1863_v63 = vpop.f32.mrf.mxu2 }
 0x56b   :  { %v3557_v24 = vadd.f32 %v1863_v63, %v1775_v34 }
 0x56c   :  { %v1655_v3 = vpop.f32.mrf.mxu0 }
 0x56d   :  { %v3540_v5 = vadd.f32 %v1655_v3, %v1567_v50  ;;  %v1776_v38 = vpop.f32.mrf.mxu1  ;;  %v1584_v50 = vpop.f32.mrf.mxu3 }
 0x56e   :  { %v1777_v36 = vadd.f32 %v3385_v53, %v1776_v38 }
 0x572   :  { %v1865_v0 = vpop.f32.mrf.mxu2 }
 0x573   :  { %v3559_v48 = vadd.f32 %v1865_v0, %v1777_v36 }
 0x574   :  { %v1658_v62 = vpop.f32.mrf.mxu0 }
 0x575   :  { %v3549_v41 = vadd.f32 %v1658_v62, %v1570_v32  ;;  %v1779_v39 = vpop.f32.mrf.mxu1  ;;  %v1586_v43 = vpop.f32.mrf.mxu3 }
 0x576   :  { %v1780_v12 = vadd.f32 %v3385_v53, %v1779_v39  ;;  %v1587_v39 = vadd.f32 %v3385_v53, %v1586_v43 }
 0x57a   :  { %v1868_v46 = vpop.f32.mrf.mxu2 }
 0x57b   :  { %v3565_v49 = vadd.f32 %v1868_v46, %v1780_v12 }
 0x57c   :  { %v1660_v23 = vpop.f32.mrf.mxu0 }
 0x57d   :  { %v3552_v55 = vadd.f32 %v1660_v23, %v1572_v56  ;;  %v1781_v51 = vpop.f32.mrf.mxu1  ;;  %v1589_v7 = vpop.f32.mrf.mxu3  ;;  %v3577_v23 = vld [vmem:[%s3659_s1] sm:$0xff] }
 0x57e   :  { %v1782_v45 = vadd.f32 %v3385_v53, %v1781_v51  ;;  %1943 = vmatmul.f32.vlgmr.msra.gmra.mxu3 %v3577_v23 }
 0x582   :  { %v1870_v20 = vpop.f32.mrf.mxu2 }
 0x583   :  { %v3567_v35 = vadd.f32 %v1870_v20, %v1782_v45 }
 0x584   :  { %v1663_v15 = vpop.f32.mrf.mxu0 }
 0x585   :  { %v3561_v19 = vadd.f32 %v1663_v15, %v1575_v42  ;;  %v1784_v1 = vpop.f32.mrf.mxu1  ;;  %v1591_v38 = vpop.f32.mrf.mxu3  ;;  %v1590_v42 = vadd.f32 %v3385_v53, %v1589_v7  ;;  %v1585_v15 = vadd.f32 %v3385_v53, %v1584_v50  ;;  %v1577_v50 = vadd.f32 %v3385_v53, %v1576_v31 }
 0x586   :  { %v1785_v32 = vadd.f32 %v3385_v53, %v1784_v1  ;;  %v1592_v36 = vadd.f32 %v3385_v53, %v1591_v38  ;;  %v1580_v1 = vadd.f32 %v3385_v53, %v1579_v33  ;;  %v1705_v31 = vmax.f32 %v3549_v41, 0.0 }
 0x587   :  { %v1699_v41 = vmax.f32 %v3503_v11, 0.0  ;;  %v1905_v11 = vmax.f32 %v3495_v29, 0.0  ;;  %v1899_v29 = vmax.f32 %v3461_v60, 0.0 }
 0x58a   :  { %v1873_v58 = vpop.f32.mrf.mxu2 }
 0x58b   :  { %v3570_v54 = vadd.f32 %v1873_v58, %v1785_v32  ;;  %v1582_v32 = vadd.f32 %v3385_v53, %v1581_v59 }
 0x58c   :  { %v1665_v4 = vpop.f32.mrf.mxu0 }
 0x58d   :  { %v3572_v56 = vpop.f32.mrf.mxu1 }
 0x592   :  { %v3581_v34 = vpop.f32.mrf.mxu2 }
 0x594   :  { %v1668_v14 = vpop.f32.mrf.mxu0 }
 0x595   :  { %v3586_v20 = vpop.f32.mrf.mxu1  ;;  %v1669_v43 = vadd.f32 %v1668_v14, %v1580_v1  ;;  %v1703_v14 = vmax.f32 %v3537_v13, 0.0  ;;  %v3610_v13 = vld [vmem:[%s3659_s1 + $0x8] sm:$0xff] }
 0x59a   :  { %v3590_v8 = vpop.f32.mrf.mxu2 }
 0x59c   :  { %v1670_v3 = vpop.f32.mrf.mxu0 }
 0x59d   :  { %v1671_v37 = vadd.f32 %v1670_v3, %v1582_v32  ;;  %v3593_v33 = vpop.f32.mrf.mxu1  ;;  %v1707_v3 = vmax.f32 %v3561_v19, 0.0 }
 0x5a4   :  { %v1673_v40 = vpop.f32.mrf.mxu0 }
 0x5a5   :  { %v1674_v58 = vadd.f32 %v1673_v40, %v1585_v15  ;;  %v3596_v40 = vpop.f32.mrf.mxu2  ;;  %v1702_v15 = vmax.f32 %v3528_v28, 0.0  ;;  %v1907_v28 = vmax.f32 %v3516_v27, 0.0  ;;  %v1901_v27 = vmax.f32 %v3469_v18, 0.0 }
 0x5ac   :  { %v1675_v62 = vpop.f32.mrf.mxu0 }
 0x5ad   :  { %v1676_v12 = vadd.f32 %v1675_v62, %v1587_v39  ;;  %v1666_v62 = vadd.f32 %v1665_v4, %v1577_v50  ;;  %v1794_v4 = vpop.f32.mrf.mxu1  ;;  %v1883_v19 = vpop.f32.mrf.mxu2  ;;  %v1701_v39 = vmax.f32 %v3521_v9, 0.0 }
 0x5af   :  { %v1712_v38 = vmax.f32 %v1676_v12, 0.0  ;;  %v1708_v59 = vmax.f32 %v1666_v62, 0.0 }
 0x5b4   :  { %v1678_v63 = vpop.f32.mrf.mxu0 }
 0x5b5   :  { %v1679_v46 = vadd.f32 %v1678_v63, %v1590_v42  ;;  %v1711_v63 = vmax.f32 %v1674_v58, 0.0  ;;  %v1710_v42 = vmax.f32 %v1671_v37, 0.0  ;;  %v1704_v37 = vmax.f32 %v3540_v5, 0.0  ;;  %v1885_v9 = vpop.f32.mrf.mxu2 }
 0x5b6   :  { %v1908_v5 = vmax.f32 %v3518_v30, 0.0  ;;  %v1904_v30 = vmax.f32 %v3479_v10, 0.0  ;;  %v1898_v10 = vmax.f32 %v3450_v61, 0.0  ;;  %v1896_v58 = vmax.f32 %v3434_v25, 0.0 }
 0x5b7   :  { %v1713_v7 = vmax.f32 %v1679_v46, 0.0  ;;  %v1796_v46 = vpop.f32.mrf.mxu1  ;;  %v1894_v61 = vmax.f32 %v3415_v47, 0.0  ;;  %v1792_v25 = vadd.f32 %v3385_v53, %v3593_v33  ;;  %v1787_v47 = vadd.f32 %v3385_v53, %v3572_v56 }
 0x5b8   :  { %v1797_v60 = vadd.f32 %v3385_v53, %v1796_v46  ;;  %v1915_v56 = vmax.f32 %v3565_v49, 0.0  ;;  %v2039_v49 = vld [vmem:[#allocation5 + $0xf8] sm:$0xff]  ;;  %v2029_v46 = vld [vmem:[#allocation5 + $0xa8] sm:$0xff] }
 0x5bc   :  { %v1680_v0 = vpop.f32.mrf.mxu0 }
 0x5bd   :  { %v1681_v51 = vadd.f32 %v1680_v0, %v1592_v36  ;;  %v1709_v36 = vmax.f32 %v1669_v43, 0.0  ;;  %v1706_v0 = vmax.f32 %v3552_v55, 0.0  ;;  %v1700_v55 = vmax.f32 %v3508_v52, 0.0  ;;  %v1888_v1 = vpop.f32.mrf.mxu2 }
 0x5be   :  { %v1906_v52 = vmax.f32 %v3497_v21, 0.0  ;;  %v1900_v21 = vmax.f32 %v3463_v16, 0.0  ;;  %v1895_v16 = vmax.f32 %v3432_v57, 0.0  ;;  %v1893_v43 = vmax.f32 %v3413_v22, 0.0 }
 0x5bf   :  { %v1714_v45 = vmax.f32 %v1681_v51, 0.0  ;;  %v1903_v51 = vmax.f32 %v3477_v26, 0.0  ;;  %v1799_v12 = vpop.f32.mrf.mxu1  ;;  %v1897_v26 = vmax.f32 %v3448_v17, 0.0  ;;  %v1795_v17 = vadd.f32 %v3385_v53, %v1794_v4 }
 0x5c0   :  { %v1790_v57 = vadd.f32 %v3385_v53, %v3586_v20  ;;  %v1881_v22 = vadd.f32 %v3596_v40, %v1792_v25  ;;  %v1912_v40 = vmax.f32 %v3547_v2, 0.0  ;;  %v1911_v4 = vmax.f32 %v3545_v44, 0.0  ;;  %v2035_v2 = vld [vmem:[#allocation5 + $0xd8] sm:$0xff]  ;;  %v2034_v44 = vld [vmem:[#allocation5 + $0xd0] sm:$0xff] }
 0x5c1   :  { %1947 = vmatpush.msrb.mxu3 %v1714_v45  ;;  %v1902_v45 = vmax.f32 %v3471_v6, 0.0 }
 0x5c2   :  { %v1879_v33 = vadd.f32 %v3590_v8, %v1790_v57  ;;  %v1914_v8 = vmax.f32 %v3559_v48, 0.0  ;;  %v2038_v48 = vld [vmem:[#allocation5 + $0xf0] sm:$0xff] }
 0x5c3   :  { %1948 = vmatpush.msrb.mxu3 %v1713_v7  ;;  %v1800_v7 = vadd.f32 %v3385_v53, %v1799_v12  ;;  %v2020_v12 = vld [vmem:[#allocation5 + $0x68] sm:$0xff] }
 0x5c4   :  { %v1919_v20 = vmax.f32 %v1879_v33, 0.0 }
 0x5c5   :  { %1949 = vmatpush.msrb.mxu3 %v1712_v38  ;;  %v1890_v18 = vpop.f32.mrf.mxu2  ;;  %v1889_v50 = vadd.f32 %v1888_v1, %v1800_v7  ;;  %v2017_v1 = vld [vmem:[#allocation5 + $0x50] sm:$0xff] }
 0x5c6   :  { %v2009_v7 = vld [vmem:[#allocation5 + $0x10] sm:$0xff] }
 0x5c7   :  { %1950 = vmatpush.msrb.mxu3 %v1711_v63  ;;  %v1801_v32 = vpop.f32.mrf.mxu1  ;;  %v1886_v63 = vadd.f32 %v1885_v9, %v1797_v60  ;;  %v2025_v9 = vld [vmem:[#allocation5 + $0x88] sm:$0xff]  ;;  %v2007_v60 = vld [vmem:[#allocation5] sm:$0xff] }
 0x5c8   :  { %v1802_v6 = vadd.f32 %v3385_v53, %v1801_v32  ;;  %v1916_v53 = vmax.f32 %v3567_v35, 0.0  ;;  %v3773_v35 = vld [vmem:[#allocation16_spill] sm:$0xff] }
 0x5c9   :  { %1951 = vmatpush.msrb.mxu3 %v1710_v42  ;;  %v1884_v42 = vadd.f32 %v1883_v19, %v1795_v17  ;;  %v2036_v19 = vld [vmem:[#allocation5 + $0xe0] sm:$0xff]  ;;  %v2013_v32 = vld [vmem:[#allocation5 + $0x30] sm:$0xff] }
 0x5ca   :  { %v1891_v38 = vadd.f32 %v1890_v18, %v1802_v6  ;;  %v2011_v6 = vld [vmem:[#allocation5 + $0x20] sm:$0xff] }
 0x5cb   :  { %1952 = vmatpush.msrb.mxu3 %v1709_v36  ;;  %v1923_v36 = vmax.f32 %v1889_v50, 0.0 }
 0x5cc   :  { %v1924_v62 = vmax.f32 %v1891_v38, 0.0 }
 0x5cd   :  { %1953 = vmatpush.msrb.mxu3 %v1708_v59  ;;  %v1922_v59 = vmax.f32 %v1886_v63, 0.0  ;;  %v2623_v63 = vld [vmem:[%s3666_s8] ss:$0 sm:$0xff] }
 0x5cf   :  { %1954 = vmatpush.msrb.mxu3 %v1707_v3  ;;  %v1921_v3 = vmax.f32 %v1884_v42, 0.0 }
 0x5d1   :  { %1955 = vmatpush.msrb.mxu3 %v1706_v0  ;;  %v1876_v0 = vadd.f32 %v3581_v34, %v1787_v47  ;;  %v1913_v34 = vmax.f32 %v3557_v24, 0.0  ;;  %v2037_v24 = vld [vmem:[#allocation5 + $0xe8] sm:$0xff] }
 0x5d3   :  { %1956 = vmatpush.msrb.mxu3 %v1705_v31  ;;  %v1920_v31 = vmax.f32 %v1881_v22, 0.0 }
 0x5d5   :  { %1957 = vmatpush.msrb.mxu3 %v1704_v37  ;;  %v1918_v37 = vmax.f32 %v1876_v0, 0.0 }
 0x5d7   :  { %1958 = vmatpush.msrb.mxu3 %v1703_v14 }
 0x5d9   :  { %1959 = vmatpush.msrb.mxu3 %v1702_v15  ;;  %v1909_v15 = vmax.f32 %v3773_v35, 0.0 }
 0x5db   :  { %1960 = vmatpush.msrb.mxu3 %v1701_v39  ;;  %v2033_v39 = vld [vmem:[#allocation5 + $0xc8] sm:$0xff] }
 0x5dd   :  { %1961 = vmatpush.msrb.mxu3 %v1700_v55  ;;  %v2032_v55 = vld [vmem:[#allocation5 + $0xc0] sm:$0xff] }
 0x5df   :  { %1962 = vmatpush.msrb.mxu3 %v1699_v41  ;;  %v2031_v41 = vld [vmem:[#allocation5 + $0xb8] sm:$0xff] }
 0x5e0   :  { %1963 = vmatmul.f32.vlgmr.msrb.gmra.mxu3 %v3610_v13 }
 0x5e1   :  { %1967 = vmatpush.msra.mxu3 %v1908_v5  ;;  %v2030_v5 = vld [vmem:[#allocation5 + $0xb0] sm:$0xff] }
 0x5e3   :  { %1968 = vmatpush.msra.mxu3 %v1907_v28  ;;  %v2027_v28 = vld [vmem:[#allocation5 + $0x98] sm:$0xff] }
 0x5e5   :  { %1969 = vmatpush.msra.mxu3 %v1906_v52  ;;  %v2026_v52 = vld [vmem:[#allocation5 + $0x90] sm:$0xff] }
 0x5e7   :  { %1970 = vmatpush.msra.mxu3 %v1905_v11  ;;  %v2024_v11 = vld [vmem:[#allocation5 + $0x80] sm:$0xff] }
 0x5e9   :  { %1971 = vmatpush.msra.mxu3 %v1904_v30  ;;  %v2022_v30 = vld [vmem:[#allocation5 + $0x78] sm:$0xff] }
 0x5eb   :  { %1972 = vmatpush.msra.mxu3 %v1903_v51  ;;  %v2021_v51 = vld [vmem:[#allocation5 + $0x70] sm:$0xff] }
 0x5ed   :  { %1973 = vmatpush.msra.mxu3 %v1902_v45  ;;  %v2019_v45 = vld [vmem:[#allocation5 + $0x60] sm:$0xff] }
 0x5ef   :  { %1974 = vmatpush.msra.mxu3 %v1901_v27  ;;  %v2018_v27 = vld [vmem:[#allocation5 + $0x58] sm:$0xff] }
 0x5f1   :  { %1975 = vmatpush.msra.mxu3 %v1900_v21  ;;  %v2016_v21 = vld [vmem:[#allocation5 + $0x48] sm:$0xff] }
 0x5f3   :  { %1976 = vmatpush.msra.mxu3 %v1899_v29  ;;  %v2015_v29 = vld [vmem:[#allocation5 + $0x40] sm:$0xff] }
 0x5f5   :  { %1977 = vmatpush.msra.mxu3 %v1898_v10  ;;  %v2014_v10 = vld [vmem:[#allocation5 + $0x38] sm:$0xff] }
 0x5f7   :  { %1978 = vmatpush.msra.mxu3 %v1897_v26  ;;  %v2012_v26 = vld [vmem:[#allocation5 + $0x28] sm:$0xff] }
 0x5f9   :  { %1979 = vmatpush.msra.mxu3 %v1896_v58  ;;  %v2010_v58 = vld [vmem:[#allocation5 + $0x18] sm:$0xff] }
 0x5fb   :  { %1980 = vmatpush.msra.mxu3 %v1895_v16  ;;  %v2008_v16 = vld [vmem:[#allocation5 + $0x8] sm:$0xff] }
 0x5fd   :  { %1981 = vmatpush.msra.mxu3 %v1894_v61 }
 0x5ff   :  { %1982 = vmatpush.msra.mxu3 %v1893_v43 }
 0x600   :  { %1983 = vmatmul.f32.vlgmr.msra.gmra.mxu3 %v3577_v23  ;;  %v1917_v23 = vmax.f32 %v3570_v54, 0.0  ;;  %v3772_v54 = vld [vmem:[#allocation35_spill] sm:$0xff] }
 0x601   :  { %1987 = vmatpush.msrb.mxu3 %v1924_v62  ;;  %v1910_v14 = vmax.f32 %v3772_v54, 0.0  ;;  %v1944_v18 = vpop.f32.mrf.mxu3 }
 0x603   :  { %1988 = vmatpush.msrb.mxu3 %v1923_v36 }
 0x605   :  { %1989 = vmatpush.msrb.mxu3 %v1922_v59 }
 0x607   :  { %1990 = vmatpush.msrb.mxu3 %v1921_v3 }
 0x609   :  { %1991 = vmatpush.msrb.mxu3 %v1920_v31 }
 0x60b   :  { %1992 = vmatpush.msrb.mxu3 %v1919_v20 }
 0x60d   :  { %1993 = vmatpush.msrb.mxu3 %v1918_v37 }
 0x60f   :  { %1994 = vmatpush.msrb.mxu3 %v1917_v23 }
 0x611   :  { %1995 = vmatpush.msrb.mxu3 %v1916_v53 }
 0x613   :  { %1996 = vmatpush.msrb.mxu3 %v1915_v56 }
 0x615   :  { %1997 = vmatpush.msrb.mxu3 %v1914_v8 }
 0x617   :  { %1998 = vmatpush.msrb.mxu3 %v1913_v34 }
 0x619   :  { %1999 = vmatpush.msrb.mxu3 %v1912_v40 }
 0x61b   :  { %2000 = vmatpush.msrb.mxu3 %v1911_v4 }
 0x61d   :  { %2001 = vmatpush.msrb.mxu3 %v1910_v14 }
 0x61f   :  { %2002 = vmatpush.msrb.mxu3 %v1909_v15 }
 0x620   :  { %2003 = vmatmul.f32.vlgmr.msrb.gmra.mxu3 %v3610_v13  ;;  %v2028_v13 = vld [vmem:[#allocation5 + $0xa0] sm:$0xff] }
 0x621   :  { %2040 = vmatpush.msra.mxu3 %v2039_v49 }
 0x623   :  { %2041 = vmatpush.msra.mxu3 %v2038_v48 }
 0x625   :  { %2042 = vmatpush.msra.mxu3 %v2037_v24 }
 0x627   :  { %2043 = vmatpush.msra.mxu3 %v2036_v19 }
 0x629   :  { %2044 = vmatpush.msra.mxu3 %v2035_v2 }
 0x62b   :  { %2045 = vmatpush.msra.mxu3 %v2034_v44 }
 0x62d   :  { %2046 = vmatpush.msra.mxu3 %v2033_v39 }
 0x62f   :  { %2047 = vmatpush.msra.mxu3 %v2032_v55 }
 0x631   :  { %2048 = vmatpush.msra.mxu3 %v2031_v41 }
 0x633   :  { %2049 = vmatpush.msra.mxu3 %v2030_v5 }
 0x635   :  { %2050 = vmatpush.msra.mxu3 %v2029_v46 }
 0x637   :  { %2051 = vmatpush.msra.mxu3 %v2028_v13 }
 0x639   :  { %2052 = vmatpush.msra.mxu3 %v2027_v28 }
 0x63b   :  { %2053 = vmatpush.msra.mxu3 %v2026_v52 }
 0x63d   :  { %2054 = vmatpush.msra.mxu3 %v2025_v9 }
 0x63f   :  { %2055 = vmatpush.msra.mxu3 %v2024_v11 }
 0x641   :  { %2060 = vmatpush.msrb.mxu3 %v2022_v30 }
 0x643   :  { %2061 = vmatpush.msrb.mxu3 %v2021_v51 }
 0x645   :  { %2062 = vmatpush.msrb.mxu3 %v2020_v12 }
 0x647   :  { %2063 = vmatpush.msrb.mxu3 %v2019_v45 }
 0x649   :  { %2064 = vmatpush.msrb.mxu3 %v2018_v27 }
 0x64b   :  { %2065 = vmatpush.msrb.mxu3 %v2017_v1 }
 0x64d   :  { %2066 = vmatpush.msrb.mxu3 %v2016_v21 }
 0x64f   :  { %2067 = vmatpush.msrb.mxu3 %v2015_v29 }
 0x651   :  { %2068 = vmatpush.msrb.mxu3 %v2014_v10 }
 0x653   :  { %2069 = vmatpush.msrb.mxu3 %v2013_v32 }
 0x655   :  { %2070 = vmatpush.msrb.mxu3 %v2012_v26 }
 0x657   :  { %2071 = vmatpush.msrb.mxu3 %v2011_v6 }
 0x659   :  { %2072 = vmatpush.msrb.mxu3 %v2010_v58 }
 0x65b   :  { %2073 = vmatpush.msrb.mxu3 %v2009_v7 }
 0x65d   :  { %2074 = vmatpush.msrb.mxu3 %v2008_v16 }
 0x65f   :  { %2075 = vmatpush.msrb.mxu3 %v2007_v60 }
 0x663   :  { %v1964_v38 = vpop.f32.mrf.mxu3 }
 0x664   :  { %v1965_v43 = vadd.f32 %v1964_v38, %v1944_v18 }
 0x683   :  { %v1984_v61 = vpop.f32.mrf.mxu3 }
 0x6a3   :  { %v2004_v17 = vpop.f32.mrf.mxu3 }
 0x6a4   :  { %v2005_v50 = vadd.f32 %v2004_v17, %v1984_v61 }
 0x6a6   :  { %2056 = vmatmul.f32.vlgmr.msra.gmra.mxu3 %v2005_v50 }
 0x6ae   :  { %2076 = vmatmul.f32.vlgmr.msrb.gmra.mxu3 %v1965_v43 }
 0x729   :  { %v2057_v25 = vpop.f32.mrf.mxu3 }
 0x731   :  { %v2077_v62 = vpop.f32.mrf.mxu3 }
 0x732   :  { %v2078_v57 = vadd.f32 %v2077_v62, %v2057_v25 }
 0x734   :  { %v2084_v42 = vadd.f32 %v2623_v63, %v2078_v57 }
 0x736   :  { %2085 = vst [vmem:[#allocation7] sm:$0xff] %v2084_v42 }
 0x737   :  { %2096 = dma.vmem_to_hbm [thread:$0]  %s2092_s21, 128, %s2094_s23, [#allocation4]  }
 0x738   :  { %2701 = dma.done.wait [#allocation4], 128  }
 0x739   :  { %2702 = vsyncadd [#allocation4], 4294967168 }
 0x73a   :  { %2101 = vsyncpa [#allocation3], 1 }
 0x73b   :  { %2102 = vsyncpa [#allocation6], 1 }
 0x73c   :  { %2103 = vsyncpa [#allocation4], 1 }

</bundles_post_ra>
